<compile_context>
chip_gen: v7x
topology: tpu7x:2x2x1
jax: 0.10.0
libtpu: 0.0.40
codegen_flags: <defaults>
</compile_context>

<pallas_src>
import math

import jax
import jax.numpy as jnp
from jax.experimental import pallas as pl
from jax.experimental.pallas import tpu as pltpu


# ---------------------------------------------------------------------------
# Fused 3x3 conv + bias + PReLU kernel (one batch element per grid step).
# ---------------------------------------------------------------------------
def _conv3x3_prelu_kernel(x_ref, w_ref, b_ref, a_ref, o_ref):
    # x_ref: (H+2, W+2, Cin)  zero-padded NHWC tile for one batch element
    # w_ref: (9, Cin, Cout)   taps in row-major (ky, kx) order
    # b_ref: (1, Cout)        bias
    # a_ref: (1, Cout)        PReLU negative slope (broadcast of the scalar)
    # o_ref: (H*W, Cout)      flattened spatial output
    hp, wp, cin = x_ref.shape
    _, cout = o_ref.shape
    H, W = hp - 2, wp - 2

    # 9 shifted taps, statically unrolled -> 9 MXU matmuls, f32 accumulation
    # kept in vregs (no scratch RMW).
    acc = jnp.zeros((H * W, cout), jnp.float32)
    for t in range(9):
        ky, kx = divmod(t, 3)
        xt = x_ref[pl.ds(ky, H), pl.ds(kx, W), :].reshape(H * W, cin)
        acc = acc + jnp.dot(xt, w_ref[t], preferred_element_type=jnp.float32)

    # Fused bias + PReLU (relu / lrelu are the alpha = 0 / 0.2 special cases).
    y = acc + b_ref[...]
    y = jnp.where(y >= 0.0, y, a_ref[...] * y)
    o_ref[...] = y.astype(o_ref.dtype)


# ---------------------------------------------------------------------------
# Module forward (NCHW interface, like the PyTorch module).
# ---------------------------------------------------------------------------
def conv_block_forward(params, x_nchw):
    """ConvBlock forward, default config (norm=None, activation='prelu').

    params: {"w": (Cout, Cin, 3, 3), "b": (Cout,), "alpha": scalar or (Cout,)}
    x_nchw: (B, Cin, H, W)  ->  (B, Cout, H, W)
    """
    # TODO(synk): norm='batch'/'instance' and tanh/sigmoid activation variants
    # of ConvBlock are not implemented (the module default uses neither).
    w, b = params["w"], params["b"]
    B, Cin, H, W = x_nchw.shape
    Cout = w.shape[0]

    x = jnp.transpose(x_nchw, (0, 2, 3, 1))                     # NCHW -> NHWC
    xpad = jnp.pad(x, ((0, 0), (1, 1), (1, 1), (0, 0)))         # zero padding=1
    w9 = jnp.transpose(w, (2, 3, 1, 0)).reshape(9, Cin, Cout)   # (ky*3+kx, Cin, Cout)
    b2 = b.reshape(1, Cout).astype(x.dtype)
    a2 = jnp.broadcast_to(
        jnp.asarray(params["alpha"], x.dtype).reshape(-1), (Cout,)
    ).reshape(1, Cout)

    out = pl.pallas_call(
        _conv3x3_prelu_kernel,
        out_shape=jax.ShapeDtypeStruct((B, H * W, Cout), x.dtype),
        grid=(B,),
        in_specs=[
            pl.BlockSpec((None, H + 2, W + 2, Cin), lambda bb: (bb, 0, 0, 0)),
            pl.BlockSpec((9, Cin, Cout), lambda bb: (0, 0, 0)),
            pl.BlockSpec((1, Cout), lambda bb: (0, 0)),
            pl.BlockSpec((1, Cout), lambda bb: (0, 0)),
        ],
        out_specs=pl.BlockSpec((None, H * W, Cout), lambda bb: (bb, 0, 0)),
        compiler_params=pltpu.CompilerParams(
            dimension_semantics=("parallel",),
            vmem_limit_bytes=32 * 1024 * 1024,
        ),
    )(xpad, w9, b2, a2)

    return jnp.transpose(out.reshape(B, H, W, Cout), (0, 3, 1, 2))  # -> NCHW


# ---------------------------------------------------------------------------
# Pure-JAX reference for validation.
# ---------------------------------------------------------------------------
def _ref_forward(params, x_nchw):
    y = jax.lax.conv_general_dilated(
        x_nchw, params["w"], window_strides=(1, 1),
        padding=((1, 1), (1, 1)),
        dimension_numbers=("NCHW", "OIHW", "NCHW"))
    y = y + params["b"].reshape(1, -1, 1, 1)
    a = jnp.asarray(params["alpha"], y.dtype)
    return jnp.where(y >= 0.0, y, a * y)


if __name__ == "__main__":
    B, Cin, Cout, H, W = 2, 4, 8, 16, 16
    key = jax.random.PRNGKey(0)
    kx, kw, kb = jax.random.split(key, 3)

    x = jax.random.normal(kx, (B, Cin, H, W), jnp.float32)
    params = {
        "w": jax.random.normal(kw, (Cout, Cin, 3, 3), jnp.float32)
             / math.sqrt(Cin * 9),
        "b": 0.1 * jax.random.normal(kb, (Cout,), jnp.float32),
        "alpha": jnp.float32(0.25),   # torch.nn.PReLU() default init
    }

    out = conv_block_forward(params, x)
    jax.block_until_ready(out)

    ref = _ref_forward(params, x)
    err = float(jnp.max(jnp.abs(out - ref)))
    assert out.shape == (B, Cout, H, W), out.shape
    assert err < 2e-3, f"max abs error too large: {err}"
    print("KERNEL_OK")
</pallas_src>

<mosaic_0001>
module attributes {stable_mosaic.version = 11 : i64} {
  func.func @_conv3x3_prelu_kernel(%arg0: i32, %arg1: memref<1x18x18x4xf32, #tpu.memory_space<vmem>>, %arg2: memref<9x4x8xf32, #tpu.memory_space<vmem>>, %arg3: memref<1x8xf32, #tpu.memory_space<vmem>>, %arg4: memref<1x8xf32, #tpu.memory_space<vmem>>, %arg5: memref<1x256x8xf32, #tpu.memory_space<vmem>>) attributes {dimension_semantics = [#tpu.dimension_semantics<parallel>], iteration_bounds = array<i64: 2>, scalar_prefetch = 0 : i64, scratch_operands = 0 : i64, tpu.core_type = #tpu.core_type<tc>, window_params = [{transform_indices = @transform_0, window_bounds = array<i64: 1, 18, 18, 4>}, {pipeline_mode = #tpu.pipeline_mode<synchronous>, transform_indices = @transform_1, window_bounds = array<i64: 9, 4, 8>}, {pipeline_mode = #tpu.pipeline_mode<synchronous>, transform_indices = @transform_2, window_bounds = array<i64: 1, 8>}, {pipeline_mode = #tpu.pipeline_mode<synchronous>, transform_indices = @transform_3, window_bounds = array<i64: 1, 8>}, {transform_indices = @transform_4, window_bounds = array<i64: 1, 256, 8>}]} {
    %cst = arith.constant 0.000000e+00 : f32
    %0 = vector.broadcast %cst : f32 to vector<256x8xf32>
    %c0 = arith.constant 0 : index
    %c0_0 = arith.constant 0 : index
    %c0_1 = arith.constant 0 : index
    %c0_2 = arith.constant 0 : index
    %1 = vector.load %arg1[%c0, %c0_0, %c0_1, %c0_2] : memref<1x18x18x4xf32, #tpu.memory_space<vmem>>, vector<1x16x16x4xf32>
    %2 = vector.shape_cast %1 : vector<1x16x16x4xf32> to vector<16x16x4xf32>
    %3 = vector.shape_cast %2 : vector<16x16x4xf32> to vector<256x4xf32>
    %c0_3 = arith.constant 0 : index
    %c0_4 = arith.constant 0 : index
    %c0_5 = arith.constant 0 : index
    %4 = vector.load %arg2[%c0_3, %c0_4, %c0_5] : memref<9x4x8xf32, #tpu.memory_space<vmem>>, vector<1x4x8xf32>
    %5 = vector.shape_cast %4 : vector<1x4x8xf32> to vector<4x8xf32>
    %cst_6 = arith.constant dense<0.000000e+00> : vector<256x8xf32>
    %6 = tpu.matmul %3, %5, %cst_6 {dimension_numbers = #tpu.dot_dimension_numbers<[1], [0], [0], [1], [0, 0, 1, 1], [], []>} : vector<256x4xf32>, vector<4x8xf32>, vector<256x8xf32> -> vector<256x8xf32>
    %7 = arith.addf %0, %6 : vector<256x8xf32>
    %c0_7 = arith.constant 0 : index
    %c0_8 = arith.constant 0 : index
    %c1 = arith.constant 1 : index
    %c0_9 = arith.constant 0 : index
    %8 = vector.load %arg1[%c0_7, %c0_8, %c1, %c0_9] : memref<1x18x18x4xf32, #tpu.memory_space<vmem>>, vector<1x16x16x4xf32>
    %9 = vector.shape_cast %8 : vector<1x16x16x4xf32> to vector<16x16x4xf32>
    %10 = vector.shape_cast %9 : vector<16x16x4xf32> to vector<256x4xf32>
    %c1_10 = arith.constant 1 : index
    %c0_11 = arith.constant 0 : index
    %c0_12 = arith.constant 0 : index
    %11 = vector.load %arg2[%c1_10, %c0_11, %c0_12] : memref<9x4x8xf32, #tpu.memory_space<vmem>>, vector<1x4x8xf32>
    %12 = vector.shape_cast %11 : vector<1x4x8xf32> to vector<4x8xf32>
    %cst_13 = arith.constant dense<0.000000e+00> : vector<256x8xf32>
    %13 = tpu.matmul %10, %12, %cst_13 {dimension_numbers = #tpu.dot_dimension_numbers<[1], [0], [0], [1], [0, 0, 1, 1], [], []>} : vector<256x4xf32>, vector<4x8xf32>, vector<256x8xf32> -> vector<256x8xf32>
    %14 = arith.addf %7, %13 : vector<256x8xf32>
    %c0_14 = arith.constant 0 : index
    %c0_15 = arith.constant 0 : index
    %c2 = arith.constant 2 : index
    %c0_16 = arith.constant 0 : index
    %15 = vector.load %arg1[%c0_14, %c0_15, %c2, %c0_16] : memref<1x18x18x4xf32, #tpu.memory_space<vmem>>, vector<1x16x16x4xf32>
    %16 = vector.shape_cast %15 : vector<1x16x16x4xf32> to vector<16x16x4xf32>
    %17 = vector.shape_cast %16 : vector<16x16x4xf32> to vector<256x4xf32>
    %c2_17 = arith.constant 2 : index
    %c0_18 = arith.constant 0 : index
    %c0_19 = arith.constant 0 : index
    %18 = vector.load %arg2[%c2_17, %c0_18, %c0_19] : memref<9x4x8xf32, #tpu.memory_space<vmem>>, vector<1x4x8xf32>
    %19 = vector.shape_cast %18 : vector<1x4x8xf32> to vector<4x8xf32>
    %cst_20 = arith.constant dense<0.000000e+00> : vector<256x8xf32>
    %20 = tpu.matmul %17, %19, %cst_20 {dimension_numbers = #tpu.dot_dimension_numbers<[1], [0], [0], [1], [0, 0, 1, 1], [], []>} : vector<256x4xf32>, vector<4x8xf32>, vector<256x8xf32> -> vector<256x8xf32>
    %21 = arith.addf %14, %20 : vector<256x8xf32>
    %c0_21 = arith.constant 0 : index
    %c1_22 = arith.constant 1 : index
    %c0_23 = arith.constant 0 : index
    %c0_24 = arith.constant 0 : index
    %22 = vector.load %arg1[%c0_21, %c1_22, %c0_23, %c0_24] : memref<1x18x18x4xf32, #tpu.memory_space<vmem>>, vector<1x16x16x4xf32>
    %23 = vector.shape_cast %22 : vector<1x16x16x4xf32> to vector<16x16x4xf32>
    %24 = vector.shape_cast %23 : vector<16x16x4xf32> to vector<256x4xf32>
    %c3 = arith.constant 3 : index
    %c0_25 = arith.constant 0 : index
    %c0_26 = arith.constant 0 : index
    %25 = vector.load %arg2[%c3, %c0_25, %c0_26] : memref<9x4x8xf32, #tpu.memory_space<vmem>>, vector<1x4x8xf32>
    %26 = vector.shape_cast %25 : vector<1x4x8xf32> to vector<4x8xf32>
    %cst_27 = arith.constant dense<0.000000e+00> : vector<256x8xf32>
    %27 = tpu.matmul %24, %26, %cst_27 {dimension_numbers = #tpu.dot_dimension_numbers<[1], [0], [0], [1], [0, 0, 1, 1], [], []>} : vector<256x4xf32>, vector<4x8xf32>, vector<256x8xf32> -> vector<256x8xf32>
    %28 = arith.addf %21, %27 : vector<256x8xf32>
    %c0_28 = arith.constant 0 : index
    %c1_29 = arith.constant 1 : index
    %c1_30 = arith.constant 1 : index
    %c0_31 = arith.constant 0 : index
    %29 = vector.load %arg1[%c0_28, %c1_29, %c1_30, %c0_31] : memref<1x18x18x4xf32, #tpu.memory_space<vmem>>, vector<1x16x16x4xf32>
    %30 = vector.shape_cast %29 : vector<1x16x16x4xf32> to vector<16x16x4xf32>
    %31 = vector.shape_cast %30 : vector<16x16x4xf32> to vector<256x4xf32>
    %c4 = arith.constant 4 : index
    %c0_32 = arith.constant 0 : index
    %c0_33 = arith.constant 0 : index
    %32 = vector.load %arg2[%c4, %c0_32, %c0_33] : memref<9x4x8xf32, #tpu.memory_space<vmem>>, vector<1x4x8xf32>
    %33 = vector.shape_cast %32 : vector<1x4x8xf32> to vector<4x8xf32>
    %cst_34 = arith.constant dense<0.000000e+00> : vector<256x8xf32>
    %34 = tpu.matmul %31, %33, %cst_34 {dimension_numbers = #tpu.dot_dimension_numbers<[1], [0], [0], [1], [0, 0, 1, 1], [], []>} : vector<256x4xf32>, vector<4x8xf32>, vector<256x8xf32> -> vector<256x8xf32>
    %35 = arith.addf %28, %34 : vector<256x8xf32>
    %c0_35 = arith.constant 0 : index
    %c1_36 = arith.constant 1 : index
    %c2_37 = arith.constant 2 : index
    %c0_38 = arith.constant 0 : index
    %36 = vector.load %arg1[%c0_35, %c1_36, %c2_37, %c0_38] : memref<1x18x18x4xf32, #tpu.memory_space<vmem>>, vector<1x16x16x4xf32>
    %37 = vector.shape_cast %36 : vector<1x16x16x4xf32> to vector<16x16x4xf32>
    %38 = vector.shape_cast %37 : vector<16x16x4xf32> to vector<256x4xf32>
    %c5 = arith.constant 5 : index
    %c0_39 = arith.constant 0 : index
    %c0_40 = arith.constant 0 : index
    %39 = vector.load %arg2[%c5, %c0_39, %c0_40] : memref<9x4x8xf32, #tpu.memory_space<vmem>>, vector<1x4x8xf32>
    %40 = vector.shape_cast %39 : vector<1x4x8xf32> to vector<4x8xf32>
    %cst_41 = arith.constant dense<0.000000e+00> : vector<256x8xf32>
    %41 = tpu.matmul %38, %40, %cst_41 {dimension_numbers = #tpu.dot_dimension_numbers<[1], [0], [0], [1], [0, 0, 1, 1], [], []>} : vector<256x4xf32>, vector<4x8xf32>, vector<256x8xf32> -> vector<256x8xf32>
    %42 = arith.addf %35, %41 : vector<256x8xf32>
    %c0_42 = arith.constant 0 : index
    %c2_43 = arith.constant 2 : index
    %c0_44 = arith.constant 0 : index
    %c0_45 = arith.constant 0 : index
    %43 = vector.load %arg1[%c0_42, %c2_43, %c0_44, %c0_45] : memref<1x18x18x4xf32, #tpu.memory_space<vmem>>, vector<1x16x16x4xf32>
    %44 = vector.shape_cast %43 : vector<1x16x16x4xf32> to vector<16x16x4xf32>
    %45 = vector.shape_cast %44 : vector<16x16x4xf32> to vector<256x4xf32>
    %c6 = arith.constant 6 : index
    %c0_46 = arith.constant 0 : index
    %c0_47 = arith.constant 0 : index
    %46 = vector.load %arg2[%c6, %c0_46, %c0_47] : memref<9x4x8xf32, #tpu.memory_space<vmem>>, vector<1x4x8xf32>
    %47 = vector.shape_cast %46 : vector<1x4x8xf32> to vector<4x8xf32>
    %cst_48 = arith.constant dense<0.000000e+00> : vector<256x8xf32>
    %48 = tpu.matmul %45, %47, %cst_48 {dimension_numbers = #tpu.dot_dimension_numbers<[1], [0], [0], [1], [0, 0, 1, 1], [], []>} : vector<256x4xf32>, vector<4x8xf32>, vector<256x8xf32> -> vector<256x8xf32>
    %49 = arith.addf %42, %48 : vector<256x8xf32>
    %c0_49 = arith.constant 0 : index
    %c2_50 = arith.constant 2 : index
    %c1_51 = arith.constant 1 : index
    %c0_52 = arith.constant 0 : index
    %50 = vector.load %arg1[%c0_49, %c2_50, %c1_51, %c0_52] : memref<1x18x18x4xf32, #tpu.memory_space<vmem>>, vector<1x16x16x4xf32>
    %51 = vector.shape_cast %50 : vector<1x16x16x4xf32> to vector<16x16x4xf32>
    %52 = vector.shape_cast %51 : vector<16x16x4xf32> to vector<256x4xf32>
    %c7 = arith.constant 7 : index
    %c0_53 = arith.constant 0 : index
    %c0_54 = arith.constant 0 : index
    %53 = vector.load %arg2[%c7, %c0_53, %c0_54] : memref<9x4x8xf32, #tpu.memory_space<vmem>>, vector<1x4x8xf32>
    %54 = vector.shape_cast %53 : vector<1x4x8xf32> to vector<4x8xf32>
    %cst_55 = arith.constant dense<0.000000e+00> : vector<256x8xf32>
    %55 = tpu.matmul %52, %54, %cst_55 {dimension_numbers = #tpu.dot_dimension_numbers<[1], [0], [0], [1], [0, 0, 1, 1], [], []>} : vector<256x4xf32>, vector<4x8xf32>, vector<256x8xf32> -> vector<256x8xf32>
    %56 = arith.addf %49, %55 : vector<256x8xf32>
    %c0_56 = arith.constant 0 : index
    %c2_57 = arith.constant 2 : index
    %c2_58 = arith.constant 2 : index
    %c0_59 = arith.constant 0 : index
    %57 = vector.load %arg1[%c0_56, %c2_57, %c2_58, %c0_59] : memref<1x18x18x4xf32, #tpu.memory_space<vmem>>, vector<1x16x16x4xf32>
    %58 = vector.shape_cast %57 : vector<1x16x16x4xf32> to vector<16x16x4xf32>
    %59 = vector.shape_cast %58 : vector<16x16x4xf32> to vector<256x4xf32>
    %c8 = arith.constant 8 : index
    %c0_60 = arith.constant 0 : index
    %c0_61 = arith.constant 0 : index
    %60 = vector.load %arg2[%c8, %c0_60, %c0_61] : memref<9x4x8xf32, #tpu.memory_space<vmem>>, vector<1x4x8xf32>
    %61 = vector.shape_cast %60 : vector<1x4x8xf32> to vector<4x8xf32>
    %cst_62 = arith.constant dense<0.000000e+00> : vector<256x8xf32>
    %62 = tpu.matmul %59, %61, %cst_62 {dimension_numbers = #tpu.dot_dimension_numbers<[1], [0], [0], [1], [0, 0, 1, 1], [], []>} : vector<256x4xf32>, vector<4x8xf32>, vector<256x8xf32> -> vector<256x8xf32>
    %63 = arith.addf %56, %62 : vector<256x8xf32>
    %c0_63 = arith.constant 0 : index
    %c0_64 = arith.constant 0 : index
    %64 = vector.load %arg3[%c0_63, %c0_64] : memref<1x8xf32, #tpu.memory_space<vmem>>, vector<1x8xf32>
    %65 = vector.broadcast %64 : vector<1x8xf32> to vector<256x8xf32>
    %66 = arith.addf %63, %65 : vector<256x8xf32>
    %cst_65 = arith.constant 0.000000e+00 : f32
    %67 = vector.broadcast %cst_65 : f32 to vector<256x8xf32>
    %68 = arith.cmpf oge, %66, %67 : vector<256x8xf32>
    %c0_66 = arith.constant 0 : index
    %c0_67 = arith.constant 0 : index
    %69 = vector.load %arg4[%c0_66, %c0_67] : memref<1x8xf32, #tpu.memory_space<vmem>>, vector<1x8xf32>
    %70 = vector.broadcast %69 : vector<1x8xf32> to vector<256x8xf32>
    %71 = arith.mulf %70, %66 : vector<256x8xf32>
    %72 = arith.select %68, %66, %71 : vector<256x8xi1>, vector<256x8xf32>
    %c0_68 = arith.constant 0 : index
    %c0_69 = arith.constant 0 : index
    %c0_70 = arith.constant 0 : index
    %73 = vector.load %arg5[%c0_68, %c0_69, %c0_70] : memref<1x256x8xf32, #tpu.memory_space<vmem>>, vector<1x256x8xf32>
    %74 = vector.shape_cast %73 : vector<1x256x8xf32> to vector<256x8xf32>
    %75 = vector.shape_cast %72 : vector<256x8xf32> to vector<1x256x8xf32>
    tpu.vector_store %arg5[%c0_68, %c0_69, %c0_70], %75 {strides = array<i32>} : memref<1x256x8xf32, #tpu.memory_space<vmem>>, vector<1x256x8xf32>,
    return
  }
  func.func @transform_0(%arg0: i32) -> (i32, i32, i32, i32) {
    %c0_i32 = arith.constant 0 : i32
    %c0_i32_0 = arith.constant 0 : i32
    %c0_i32_1 = arith.constant 0 : i32
    %c0_i32_2 = arith.constant 0 : i32
    return %arg0, %c0_i32, %c0_i32_0, %c0_i32_1 : i32, i32, i32, i32
  }
  func.func @transform_1(%arg0: i32) -> (i32, i32, i32) {
    %c0_i32 = arith.constant 0 : i32
    %c0_i32_0 = arith.constant 0 : i32
    %c0_i32_1 = arith.constant 0 : i32
    %c0_i32_2 = arith.constant 0 : i32
    return %c0_i32, %c0_i32_0, %c0_i32_1 : i32, i32, i32
  }
  func.func @transform_2(%arg0: i32) -> (i32, i32) {
    %c0_i32 = arith.constant 0 : i32
    %c0_i32_0 = arith.constant 0 : i32
    %c0_i32_1 = arith.constant 0 : i32
    return %c0_i32, %c0_i32_0 : i32, i32
  }
  func.func @transform_3(%arg0: i32) -> (i32, i32) {
    %c0_i32 = arith.constant 0 : i32
    %c0_i32_0 = arith.constant 0 : i32
    %c0_i32_1 = arith.constant 0 : i32
    return %c0_i32, %c0_i32_0 : i32, i32
  }
  func.func @transform_4(%arg0: i32) -> (i32, i32, i32) {
    %c0_i32 = arith.constant 0 : i32
    %c0_i32_0 = arith.constant 0 : i32
    %c0_i32_1 = arith.constant 0 : i32
    return %arg0, %c0_i32, %c0_i32_0 : i32, i32, i32
  }
}

</mosaic_0001>

<bundles_post_ra>
// kernel: tpu_custom_call.1
= control target key start
LH: loop header
LB: loop body
LE: loop exit
PB: predicated region body
PF: predicated region fallthrough
CT: control target
= control target key end

     0   :  { %s5434_s15 = smov 0   ;;  %s6546_s0 = inlined_call_operand.vmem [shape: f32[2,18,18,4], index: 0, kind: input, shape index: {}]   ;;  %s6547_s1 = inlined_call_operand.vmem [shape: f32[9,4,8], index: 1, kind: input, shape index: {}]   ;;  %s6548_s2 = inlined_call_operand.vmem [shape: f32[1,8], index: 2, kind: input, shape index: {}]   ;;  %s6549_s3 = inlined_call_operand.vmem [shape: f32[1,8], index: 3, kind: input, shape index: {}]   ;;  %s6550_s4 = inlined_call_operand.vmem [shape: f32[2,256,8], index: 4, kind: output, shape index: {}]  }
   0x1 LB: > { %s3877_s16 = sadd.s32 4294967295, %s5407_s15   ;;  %p3881_p0 = scmp.ge.s32.totalorder %s5407_s15, 1  ;;  %s5407_s15 = sphi %s5434_s15, %s14_s15  }
   0x2   : > { %p162_p1 = scmp.lt.s32.totalorder %s5407_s15, 3 }
   0x4   : > { %p163_p2 = pnand %p3881_p0, %p162_p1 }
   0x6   : > { %166 = sbr.rel (%p163_p2) target bundleno = 526 (0x20e), region = 36 }
   0xd   : > { %v3885_v0 = vld [vmem:[%s6547_s1 + $0x4] sm:$0xf]  ;;  %vm362_vm0 = vcmask 1043456   ;;  %v5448_v1 = vld [vmem:[%s6547_s1 + $0x10] sm:$0xf]  ;;  %p188_p3 = scmp.lt.s32.totalorder %s3877_s16, 1 }
   0xe   : > { %4684 = vmatprep.subr.msk.mxu1 %vm362_vm0, %v3885_v0  ;;  %4884 = vmatprep.subr.msk.mxu0 %vm362_vm0, %v5448_v1  ;;  %v230_v2 = vld [vmem:[%s6547_s1] sm:$0xf]  ;;  %v4150_v3 = vld [vmem:[%s6547_s1 + $0x14] sm:$0xf]  ;;  %vm265_vm1 = vcmask 31744   ;;  %vm3789_vm3 = vcmask 64512  }
   0xf   : > { %4685 = vmatpush3.msk.msra.mxu1 %vm362_vm0, %v3885_v0  ;;  %4885 = vmatpush3.msk.msra.mxu0 %vm362_vm0, %v5448_v1  ;;  %s6661_s16 = smov (!%p188_p3, %s3877_s16), 1  ;;  %v4216_v9 = vld [vmem:[%s6547_s1 + $0x18] sm:$0xf]  ;;  %v5489_v10 = vld [vmem:[%s6547_s1 + $0x8] sm:$0xf] }
  0x10   : > { %4734 = vmatprep.subr.msk.mxu1 %vm362_vm0, %v230_v2  ;;  %4934 = vmatprep.subr.msk.mxu0 %vm362_vm0, %v4150_v3  ;;  %s5392_s25 = smul.u32 432, %s6661_s16  ;;  %v5608_v28 = vld [vmem:[%s6547_s1 + $0x1c] sm:$0xf]  ;;  %v5771_v61 = vld [vmem:[%s6547_s1 + $0xc] sm:$0xf]  ;;  %s4386_s17 = sshll.u32 %s6661_s16, 8 }
  0x11   : > { %s6407_s22 = scalar_lea.vmem %s6550_s4, %s4386_s17 }
  0x12   : > { %s5470_s28 = scalar_lea.vmem %s6546_s0, %s5392_s25 }
  0x13   : > { %v231_v4 = vld [vmem:[%s5470_s28 + $0x1] sm:$0xff]  ;;  %v4052_v5 = vld [vmem:[%s5470_s28 + $0x19] sm:$0xff]  ;;  %v232_v6 = vld [vmem:[%s5470_s28 + $0x9] sm:$0xff] }
  0x14   : > { %4686 = vmatprep.mubr.msk.f32.mxu1 %vm265_vm1, %v231_v4  ;;  %4886 = vmatprep.mubr.msk.f32.mxu0 %vm265_vm1, %v4052_v5  ;;  %v4053_v7 = vld [vmem:[%s5470_s28 + $0x21] sm:$0xff]  ;;  %v5479_v8 = vld [vmem:[%s5470_s28 + $0x31] sm:$0xff]  ;;  %v5494_v11 = vld [vmem:[%s5470_s28 + $0x39] sm:$0xff] }
  0x15   : > { %4687 = vmatmul.mubr.msk.f32.vlgmr.msra.gmra.mrb[0].mxu1 %vm265_vm1, %v232_v6  ;;  %4887 = vmatmul.mubr.msk.f32.vlgmr.msra.gmra.mrb[0].mxu0 %vm265_vm1, %v4053_v7  ;;  %v5500_v12 = vld [vmem:[%s5470_s28 + $0x49] sm:$0xff]  ;;  %v5513_v13 = vld [vmem:[%s5470_s28 + $0x51] sm:$0xff]  ;;  %v5516_v14 = vld [vmem:[%s5470_s28 + $0x61] sm:$0xff] }
  0x16   : > { %4735 = vmatpush3.msk.msra.mxu1 %vm362_vm0, %v230_v2  ;;  %4935 = vmatpush3.msk.msra.mxu0 %vm362_vm0, %v4150_v3  ;;  %v5527_v15 = vld [vmem:[%s5470_s28 + $0x69] sm:$0xff]  ;;  %v5530_v16 = vld [vmem:[%s5470_s28 + $0x79] sm:$0xff]  ;;  %v5541_v17 = vld [vmem:[%s5470_s28 + $0x81] sm:$0xff] }
  0x17   : > { %4689 = vmatprep.mubr.msk.f32.mxu1 %vm265_vm1, %v4052_v5  ;;  %4889 = vmatprep.mubr.msk.f32.mxu0 %vm265_vm1, %v5479_v8  ;;  %v5544_v18 = vld [vmem:[%s5470_s28 + $0x91] sm:$0xff]  ;;  %v5555_v19 = vld [vmem:[%s5470_s28 + $0x99] sm:$0xff]  ;;  %v5558_v20 = vld [vmem:[%s5470_s28 + $0xa9] sm:$0xff] }
  0x18   : > { %4984 = vmatprep.subr.msk.mxu0 %vm362_vm0, %v4216_v9  ;;  %4784 = vmatprep.subr.msk.mxu1 %vm362_vm0, %v5489_v10  ;;  %v5569_v21 = vld [vmem:[%s5470_s28 + $0xb1] sm:$0xff]  ;;  %v5572_v22 = vld [vmem:[%s5470_s28 + $0xc1] sm:$0xff]  ;;  %v5583_v23 = vld [vmem:[%s5470_s28 + $0xc9] sm:$0xff] }
  0x19   : > { %4690 = vmatmul.mubr.msk.f32.gmra.mrb[2].mxu1 %vm265_vm1, %v4053_v7  ;;  %4890 = vmatmul.mubr.msk.f32.gmra.mrb[2].mxu0 %vm265_vm1, %v5494_v11  ;;  %v5586_v24 = vld [vmem:[%s5470_s28 + $0x1a] sm:$0xff]  ;;  %v5597_v25 = vld [vmem:[%s5470_s28 + $0x22] sm:$0xff]  ;;  %v5603_v27 = vld [vmem:[%s5470_s28 + $0x32] sm:$0xff] }
  0x1a   : > { %4692 = vmatprep.mubr.msk.f32.mxu1 %vm265_vm1, %v5479_v8  ;;  %4892 = vmatprep.mubr.msk.f32.mxu0 %vm265_vm1, %v5500_v12  ;;  %v5600_v26 = vld [vmem:[%s5470_s28 + $0xd9] sm:$0xff]  ;;  %v5618_v29 = vld [vmem:[%s5470_s28 + $0xe1] sm:$0xff]  ;;  %v5626_v31 = vld [vmem:[%s5470_s28 + $0xf1] sm:$0xff] }
  0x1b   : > { %6596 = vst [vmem:[#allocation2_spill] sm:$0xff] %v5618_v29  ;;  %v5621_v30 = vld [vmem:[%s5470_s28 + $0x3a] sm:$0xff]  ;;  %6597 = vst [vmem:[#allocation3_spill] sm:$0xff] %v5626_v31  ;;  %v5629_v32 = vld [vmem:[%s5470_s28 + $0x4a] sm:$0xff] }
  0x1c   : > { %v5642_v33 = vld [vmem:[%s5470_s28 + $0xf9] sm:$0xff]  ;;  %v5648_v35 = vld [vmem:[%s5470_s28 + $0x109] sm:$0xff]  ;;  %v5662_v37 = vld [vmem:[%s5470_s28 + $0x111] sm:$0xff] }
  0x1d   : > { %4693 = vmatmul.mubr.msk.f32.gmra.mrb[4].mxu1 %vm265_vm1, %v5494_v11  ;;  %4893 = vmatmul.mubr.msk.f32.gmra.mrb[4].mxu0 %vm265_vm1, %v5513_v13  ;;  %6598 = vst [vmem:[#allocation4_spill] sm:$0xff] %v5642_v33  ;;  %v5645_v34 = vld [vmem:[%s5470_s28 + $0x52] sm:$0xff]  ;;  %6599 = vst [vmem:[#allocation5_spill] sm:$0xff] %v5648_v35  ;;  %v5651_v36 = vld [vmem:[%s5470_s28 + $0x62] sm:$0xff] }
  0x1e   : > { %4695 = vmatprep.mubr.msk.f32.mxu1 %vm265_vm1, %v5500_v12  ;;  %4895 = vmatprep.mubr.msk.f32.mxu0 %vm265_vm1, %v5516_v14  ;;  %6600 = vst [vmem:[#allocation6_spill] sm:$0xff] %v5662_v37  ;;  %v5665_v38 = vld [vmem:[%s5470_s28 + $0x6a] sm:$0xff]  ;;  %v5668_v39 = vld [vmem:[%s5470_s28 + $0x121] sm:$0xff]  ;;  %v5688_v43 = vld [vmem:[%s5470_s28 + $0x139] sm:$0xff] }
  0x1f   : > { %6601 = vst [vmem:[#allocation7_spill] sm:$0xff] %v5668_v39  ;;  %v5671_v40 = vld [vmem:[%s5470_s28 + $0x7a] sm:$0xff]  ;;  %v5682_v41 = vld [vmem:[%s5470_s28 + $0x129] sm:$0xff]  ;;  %6603 = vst [vmem:[#allocation9_spill] sm:$0xff] %v5688_v43 }
  0x20   : > { %6602 = vst [vmem:[#allocation8_spill] sm:$0xff] %v5682_v41  ;;  %v5685_v42 = vld [vmem:[%s5470_s28 + $0x82] sm:$0xff]  ;;  %v5691_v44 = vld [vmem:[%s5470_s28 + $0x92] sm:$0xff]  ;;  %v5705_v46 = vld [vmem:[%s5470_s28 + $0x9a] sm:$0xff] }
  0x21   : > { %4696 = vmatmul.mubr.msk.f32.gmra.mrb[6].mxu1 %vm265_vm1, %v5513_v13  ;;  %4896 = vmatmul.mubr.msk.f32.gmra.mrb[6].mxu0 %vm265_vm1, %v5527_v15  ;;  %v5702_v45 = vld [vmem:[%s5470_s28 + $0x141] sm:$0xff]  ;;  %v5708_v47 = vld [vmem:[%s5470_s28 + $0x151] sm:$0xff]  ;;  %v5722_v49 = vld [vmem:[%s5470_s28 + $0x159] sm:$0xff] }
  0x22   : > { %4698 = vmatprep.mubr.msk.f32.mxu1 %vm265_vm1, %v5516_v14  ;;  %4898 = vmatprep.mubr.msk.f32.mxu0 %vm265_vm1, %v5530_v16  ;;  %6604 = vst [vmem:[#allocation10_spill] sm:$0xff] %v5702_v45  ;;  %6605 = vst [vmem:[#allocation11_spill] sm:$0xff] %v5708_v47  ;;  %v5711_v48 = vld [vmem:[%s5470_s28 + $0xaa] sm:$0xff]  ;;  %v5725_v50 = vld [vmem:[%s5470_s28 + $0xb2] sm:$0xff] }
  0x23   : > { %6606 = vst [vmem:[#allocation12_spill] sm:$0xff] %v5722_v49  ;;  %v5728_v51 = vld [vmem:[%s5470_s28 + $0x169] sm:$0xff]  ;;  %v5742_v53 = vld [vmem:[%s5470_s28 + $0x171] sm:$0xff]  ;;  %v198_v55 = vld [vmem:[%s5470_s28] sm:$0xff] }
  0x24   : > { %6607 = vst [vmem:[#allocation13_spill] sm:$0xff] %v5728_v51  ;;  %v5731_v52 = vld [vmem:[%s5470_s28 + $0xc2] sm:$0xff]  ;;  %6608 = vst [vmem:[#allocation14_spill] sm:$0xff] %v5742_v53  ;;  %v5745_v54 = vld [vmem:[%s5470_s28 + $0xca] sm:$0xff] }
  0x25   : > { %4699 = vmatmul.mubr.msk.f32.gmra.mrb[8].mxu1 %vm265_vm1, %v5527_v15  ;;  %4899 = vmatmul.mubr.msk.f32.gmra.mrb[8].mxu0 %vm265_vm1, %v5541_v17  ;;  %v5749_v56 = vld [vmem:[%s5470_s28 + $0xda] sm:$0xff]  ;;  %v199_v57 = vld [vmem:[%s5470_s28 + $0x8] sm:$0xff]  ;;  %v5766_v60 = vld [vmem:[%s5470_s28 + $0xf2] sm:$0xff] }
  0x26   : > { %4701 = vmatprep.mubr.msk.f32.mxu1 %vm265_vm1, %v5530_v16  ;;  %4901 = vmatprep.mubr.msk.f32.mxu0 %vm265_vm1, %v5544_v18  ;;  %v5760_v58 = vld [vmem:[%s5470_s28 + $0xe2] sm:$0xff]  ;;  %v5763_v59 = vld [vmem:[%s5470_s28 + $0x18] sm:$0xff]  ;;  %v5789_v0 = vld [vmem:[%s5470_s28 + $0x30] sm:$0xff] }
  0x27   : > { %6609 = vst [vmem:[#allocation15_spill] sm:$0xff] %v5763_v59  ;;  %v5781_v62 = vld [vmem:[%s5470_s28 + $0x20] sm:$0xff]  ;;  %6611 = vst [vmem:[#allocation17_spill] sm:$0xff] %v5789_v0  ;;  %v5792_v2 = vld [vmem:[%s5470_s28 + $0x10a] sm:$0xff] }
  0x28   : > { %6610 = vst [vmem:[#allocation16_spill] sm:$0xff] %v5781_v62  ;;  %v5784_v63 = vld [vmem:[%s5470_s28 + $0xfa] sm:$0xff]  ;;  %v5808_v4 = vld [vmem:[%s5470_s28 + $0x112] sm:$0xff]  ;;  %v5811_v5 = vld [vmem:[%s5470_s28 + $0x48] sm:$0xff] }
  0x29   : > { %4702 = vmatmul.mubr.msk.f32.gmra.mrb[10].mxu1 %vm265_vm1, %v5541_v17  ;;  %4902 = vmatmul.mubr.msk.f32.gmra.mrb[10].mxu0 %vm265_vm1, %v5555_v19  ;;  %v5805_v3 = vld [vmem:[%s5470_s28 + $0x38] sm:$0xff]  ;;  %6613 = vst [vmem:[#allocation19_spill] sm:$0xff] %v5811_v5  ;;  %v5814_v6 = vld [vmem:[%s5470_s28 + $0x122] sm:$0xff]  ;;  %v5825_v7 = vld [vmem:[%s5470_s28 + $0x50] sm:$0xff] }
  0x2a   : > { %4704 = vmatprep.mubr.msk.f32.mxu1 %vm265_vm1, %v5544_v18  ;;  %4904 = vmatprep.mubr.msk.f32.mxu0 %vm265_vm1, %v5558_v20  ;;  %6612 = vst [vmem:[#allocation18_spill] sm:$0xff] %v5805_v3  ;;  %6614 = vst [vmem:[#allocation20_spill] sm:$0xff] %v5825_v7 }
  0x2d   : > { %4705 = vmatmul.mubr.msk.f32.gmra.mrb[12].mxu1 %vm265_vm1, %v5555_v19  ;;  %4905 = vmatmul.mubr.msk.f32.gmra.mrb[12].mxu0 %vm265_vm1, %v5569_v21 }
  0x2e   : > { %4707 = vmatprep.mubr.msk.f32.mxu1 %vm265_vm1, %v5558_v20  ;;  %4907 = vmatprep.mubr.msk.f32.mxu0 %vm265_vm1, %v5572_v22 }
  0x31   : > { %4708 = vmatmul.mubr.msk.f32.gmra.mrb[14].mxu1 %vm265_vm1, %v5569_v21  ;;  %4908 = vmatmul.mubr.msk.f32.gmra.mrb[14].mxu0 %vm265_vm1, %v5583_v23 }
  0x32   : > { %4710 = vmatprep.mubr.msk.f32.mxu1 %vm265_vm1, %v5572_v22  ;;  %4936 = vmatprep.mubr.msk.f32.mxu0 %vm265_vm1, %v5586_v24 }
  0x35   : > { %4711 = vmatmul.mubr.msk.f32.gmra.mrb[16].mxu1 %vm265_vm1, %v5583_v23  ;;  %4937 = vmatmul.mubr.msk.f32.vlgmr.msra.gmra.mrb[0].mxu0 %vm265_vm1, %v5597_v25 }
  0x36   : > { %4985 = vmatpush3.msk.msra.mxu0 %vm362_vm0, %v4216_v9  ;;  %4713 = vmatprep.mubr.msk.f32.mxu1 %vm265_vm1, %v5600_v26  ;;  %v5828_v9 = vld [vmem:[%s5470_s28 + $0x12a] sm:$0xff] }
  0x37   : > { %4939 = vmatprep.mubr.msk.f32.mxu0 %vm265_vm1, %v5603_v27  ;;  %5034 = vmatprep.subr.msk.mxu0 %vm362_vm0, %v5608_v28 }
  0x39   : > { %4714 = vmatmul.mubr.msk.f32.gmra.mrb[18].mxu1 %vm265_vm1, %v5618_v29  ;;  %4940 = vmatmul.mubr.msk.f32.gmra.mrb[2].mxu0 %vm265_vm1, %v5621_v30  ;;  %v5925_v29 = vld [vmem:[%s5470_s28 + $0xd8] sm:$0xff] }
  0x3a   : > { %4716 = vmatprep.mubr.msk.f32.mxu1 %vm265_vm1, %v5626_v31  ;;  %4942 = vmatprep.mubr.msk.f32.mxu0 %vm265_vm1, %v5629_v32  ;;  %v5908_v31 = vld [vmem:[%s5470_s28 + $0x18a] sm:$0xff] }
  0x3b   : > { %6625 = vst [vmem:[#allocation31_spill] sm:$0xff] %v5908_v31 }
  0x3d   : > { %4717 = vmatmul.mubr.msk.f32.gmra.mrb[20].mxu1 %vm265_vm1, %v5642_v33  ;;  %4943 = vmatmul.mubr.msk.f32.gmra.mrb[4].mxu0 %vm265_vm1, %v5645_v34  ;;  %v5894_v33 = vld [vmem:[%s5470_s28 + $0x182] sm:$0xff] }
  0x3e   : > { %4719 = vmatprep.mubr.msk.f32.mxu1 %vm265_vm1, %v5648_v35  ;;  %4945 = vmatprep.mubr.msk.f32.mxu0 %vm265_vm1, %v5651_v36  ;;  %v5891_v35 = vld [vmem:[%s5470_s28 + $0xa8] sm:$0xff]  ;;  %6623 = vst [vmem:[#allocation29_spill] sm:$0xff] %v5894_v33 }
  0x3f   : > { %6622 = vst [vmem:[#allocation28_spill] sm:$0xff] %v5891_v35 }
  0x41   : > { %4720 = vmatmul.mubr.msk.f32.gmra.mrb[22].mxu1 %vm265_vm1, %v5662_v37  ;;  %4946 = vmatmul.mubr.msk.f32.gmra.mrb[6].mxu0 %vm265_vm1, %v5665_v38  ;;  %v5888_v37 = vld [vmem:[%s5470_s28 + $0x172] sm:$0xff] }
  0x42   : > { %4722 = vmatprep.mubr.msk.f32.mxu1 %vm265_vm1, %v5668_v39  ;;  %4948 = vmatprep.mubr.msk.f32.mxu0 %vm265_vm1, %v5671_v40  ;;  %v5885_v39 = vld [vmem:[%s5470_s28 + $0x98] sm:$0xff]  ;;  %6621 = vst [vmem:[#allocation27_spill] sm:$0xff] %v5888_v37 }
  0x43   : > { %6620 = vst [vmem:[#allocation26_spill] sm:$0xff] %v5885_v39 }
  0x45   : > { %4723 = vmatmul.mubr.msk.f32.gmra.mrb[24].mxu1 %vm265_vm1, %v5682_v41  ;;  %4949 = vmatmul.mubr.msk.f32.gmra.mrb[8].mxu0 %vm265_vm1, %v5685_v42  ;;  %v5874_v41 = vld [vmem:[%s5470_s28 + $0x16a] sm:$0xff] }
  0x46   : > { %4725 = vmatprep.mubr.msk.f32.mxu1 %vm265_vm1, %v5688_v43  ;;  %4951 = vmatprep.mubr.msk.f32.mxu0 %vm265_vm1, %v5691_v44  ;;  %v5871_v43 = vld [vmem:[%s5470_s28 + $0x90] sm:$0xff] }
  0x47   : > { %6619 = vst [vmem:[#allocation25_spill] sm:$0xff] %v5871_v43 }
  0x49   : > { %4726 = vmatmul.mubr.msk.f32.gmra.mrb[26].mxu1 %vm265_vm1, %v5702_v45  ;;  %4952 = vmatmul.mubr.msk.f32.gmra.mrb[10].mxu0 %vm265_vm1, %v5705_v46  ;;  %v5868_v45 = vld [vmem:[%s5470_s28 + $0x15a] sm:$0xff] }
  0x4a   : > { %4728 = vmatprep.mubr.msk.f32.mxu1 %vm265_vm1, %v5708_v47  ;;  %4954 = vmatprep.mubr.msk.f32.mxu0 %vm265_vm1, %v5711_v48  ;;  %v5865_v47 = vld [vmem:[%s5470_s28 + $0x80] sm:$0xff] }
  0x4b   : > { %6618 = vst [vmem:[#allocation24_spill] sm:$0xff] %v5865_v47 }
  0x4d   : > { %4729 = vmatmul.mubr.msk.f32.gmra.mrb[28].mxu1 %vm265_vm1, %v5722_v49  ;;  %4955 = vmatmul.mubr.msk.f32.gmra.mrb[12].mxu0 %vm265_vm1, %v5725_v50  ;;  %v5854_v49 = vld [vmem:[%s5470_s28 + $0x152] sm:$0xff] }
  0x4e   : > { %4731 = vmatprep.mubr.msk.f32.mxu1 %vm265_vm1, %v5728_v51  ;;  %4957 = vmatprep.mubr.msk.f32.mxu0 %vm265_vm1, %v5731_v52  ;;  %v5851_v51 = vld [vmem:[%s5470_s28 + $0x78] sm:$0xff] }
  0x4f   : > { %6617 = vst [vmem:[#allocation23_spill] sm:$0xff] %v5851_v51 }
  0x51   : > { %4732 = vmatmul.mubr.msk.f32.gmra.mrb[30].mxu1 %vm265_vm1, %v5742_v53  ;;  %4958 = vmatmul.mubr.msk.f32.gmra.mrb[14].mxu0 %vm265_vm1, %v5745_v54  ;;  %v5848_v53 = vld [vmem:[%s5470_s28 + $0x142] sm:$0xff] }
  0x52   : > { %4736 = vmatprep.mubr.msk.f32.mxu1 %vm265_vm1, %v198_v55  ;;  %4960 = vmatprep.mubr.msk.f32.mxu0 %vm265_vm1, %v5749_v56  ;;  %v5834_v55 = vld [vmem:[%s5470_s28 + $0x13a] sm:$0xff] }
  0x55   : > { %4737 = vmatmul.mubr.msk.f32.vlgmr.msra.gmra.mrb[0].mxu1 %vm265_vm1, %v199_v57  ;;  %4961 = vmatmul.mubr.msk.f32.gmra.mrb[16].mxu0 %vm265_vm1, %v5760_v58  ;;  %v5845_v57 = vld [vmem:[%s5470_s28 + $0x68] sm:$0xff] }
  0x56   : > { %4785 = vmatpush3.msk.msra.mxu1 %vm362_vm0, %v5489_v10  ;;  %4739 = vmatprep.mubr.msk.f32.mxu1 %vm265_vm1, %v5763_v59  ;;  %v5831_v10 = vld [vmem:[%s5470_s28 + $0x60] sm:$0xff]  ;;  %6616 = vst [vmem:[#allocation22_spill] sm:$0xff] %v5845_v57 }
  0x57   : > { %4963 = vmatprep.mubr.msk.f32.mxu0 %vm265_vm1, %v5766_v60  ;;  %4834 = vmatprep.subr.msk.mxu1 %vm362_vm0, %v5771_v61  ;;  %6615 = vst [vmem:[#allocation21_spill] sm:$0xff] %v5831_v10  ;;  %v5911_v59 = vld [vmem:[%s5470_s28 + $0xc0] sm:$0xff] }
  0x59   : > { %4740 = vmatmul.mubr.msk.f32.gmra.mrb[2].mxu1 %vm265_vm1, %v5781_v62  ;;  %4964 = vmatmul.mubr.msk.f32.gmra.mrb[18].mxu0 %vm265_vm1, %v5784_v63  ;;  %v5905_v62 = vld [vmem:[%s5470_s28 + $0xb0] sm:$0xff] }
  0x5a   : > { %4742 = vmatprep.mubr.msk.f32.mxu1 %vm265_vm1, %v5789_v0  ;;  %4966 = vmatprep.mubr.msk.f32.mxu0 %vm265_vm1, %v5792_v2  ;;  %6624 = vst [vmem:[#allocation30_spill] sm:$0xff] %v5905_v62 }
  0x5d   : > { %4743 = vmatmul.mubr.msk.f32.gmra.mrb[4].mxu1 %vm265_vm1, %v5805_v3  ;;  %4967 = vmatmul.mubr.msk.f32.gmra.mrb[20].mxu0 %vm265_vm1, %v5808_v4 }
  0x5e   : > { %4745 = vmatprep.mubr.msk.f32.mxu1 %vm265_vm1, %v5811_v5  ;;  %4969 = vmatprep.mubr.msk.f32.mxu0 %vm265_vm1, %v5814_v6 }
  0x61   : > { %4746 = vmatmul.mubr.msk.f32.gmra.mrb[6].mxu1 %vm265_vm1, %v5825_v7  ;;  %4970 = vmatmul.mubr.msk.f32.gmra.mrb[22].mxu0 %vm265_vm1, %v5828_v9 }
  0x62   : > { %4748 = vmatprep.mubr.msk.f32.mxu1 %vm265_vm1, %v5831_v10  ;;  %4972 = vmatprep.mubr.msk.f32.mxu0 %vm265_vm1, %v5834_v55 }
  0x65   : > { %4749 = vmatmul.mubr.msk.f32.gmra.mrb[8].mxu1 %vm265_vm1, %v5845_v57  ;;  %4973 = vmatmul.mubr.msk.f32.gmra.mrb[24].mxu0 %vm265_vm1, %v5848_v53 }
  0x66   : > { %4751 = vmatprep.mubr.msk.f32.mxu1 %vm265_vm1, %v5851_v51  ;;  %4975 = vmatprep.mubr.msk.f32.mxu0 %vm265_vm1, %v5854_v49 }
  0x69   : > { %4752 = vmatmul.mubr.msk.f32.gmra.mrb[10].mxu1 %vm265_vm1, %v5865_v47  ;;  %4976 = vmatmul.mubr.msk.f32.gmra.mrb[26].mxu0 %vm265_vm1, %v5868_v45 }
  0x6a   : > { %4754 = vmatprep.mubr.msk.f32.mxu1 %vm265_vm1, %v5871_v43  ;;  %4978 = vmatprep.mubr.msk.f32.mxu0 %vm265_vm1, %v5874_v41 }
  0x6d   : > { %4755 = vmatmul.mubr.msk.f32.gmra.mrb[12].mxu1 %vm265_vm1, %v5885_v39  ;;  %4979 = vmatmul.mubr.msk.f32.gmra.mrb[28].mxu0 %vm265_vm1, %v5888_v37  ;;  %v5930_v37 = vld [vmem:[%s6547_s1 + $0x20] sm:$0xf] }
  0x6e   : > { %4757 = vmatprep.mubr.msk.f32.mxu1 %vm265_vm1, %v5891_v35  ;;  %4981 = vmatprep.mubr.msk.f32.mxu0 %vm265_vm1, %v5894_v33  ;;  %v5922_v33 = vld [vmem:[%s5470_s28 + $0xc8] sm:$0xff] }
  0x6f   : > { %6626 = vst [vmem:[#allocation32_spill] sm:$0xff] %v5922_v33 }
  0x71   : > { %4758 = vmatmul.mubr.msk.f32.gmra.mrb[14].mxu1 %vm265_vm1, %v5905_v62  ;;  %4982 = vmatmul.mubr.msk.f32.gmra.mrb[30].mxu0 %vm265_vm1, %v5908_v31  ;;  %v5941_v31 = vld [vmem:[%s5470_s28 + $0xe0] sm:$0xff] }
  0x72   : > { %4760 = vmatprep.mubr.msk.f32.mxu1 %vm265_vm1, %v5911_v59  ;;  %4986 = vmatprep.mubr.msk.f32.mxu0 %vm265_vm1, %v5789_v0  ;;  %v5946_v0 = vld [vmem:[%s5470_s28 + $0xf0] sm:$0xff] }
  0x75   : > { %4761 = vmatmul.mubr.msk.f32.gmra.mrb[16].mxu1 %vm265_vm1, %v5922_v33  ;;  %4987 = vmatmul.mubr.msk.f32.vlgmr.msra.gmra.mrb[0].mxu0 %vm265_vm1, %v5805_v3  ;;  %v915_v3 = vld [vmem:[%s5470_s28 + $0x2] sm:$0xff] }
  0x76   : > { %5035 = vmatpush3.msk.msra.mxu0 %vm362_vm0, %v5608_v28  ;;  %4763 = vmatprep.mubr.msk.f32.mxu1 %vm265_vm1, %v5925_v29  ;;  %v5959_v28 = vld [vmem:[%s5470_s28 + $0xf8] sm:$0xff] }
  0x77   : > { %4989 = vmatprep.mubr.msk.f32.mxu0 %vm265_vm1, %v5811_v5  ;;  %5084 = vmatprep.subr.msk.mxu0 %vm362_vm0, %v5930_v37  ;;  %v5962_v5 = vld [vmem:[%s5470_s28 + $0x108] sm:$0xff] }
  0x79   : > { %4764 = vmatmul.mubr.msk.f32.gmra.mrb[18].mxu1 %vm265_vm1, %v5941_v31  ;;  %4990 = vmatmul.mubr.msk.f32.gmra.mrb[2].mxu0 %vm265_vm1, %v5825_v7  ;;  %v5973_v7 = vld [vmem:[%s5470_s28 + $0x110] sm:$0xff] }
  0x7a   : > { %4766 = vmatprep.mubr.msk.f32.mxu1 %vm265_vm1, %v5946_v0  ;;  %4992 = vmatprep.mubr.msk.f32.mxu0 %vm265_vm1, %v5831_v10  ;;  %v5976_v10 = vld [vmem:[%s5470_s28 + $0x120] sm:$0xff] }
  0x7d   : > { %4767 = vmatmul.mubr.msk.f32.gmra.mrb[20].mxu1 %vm265_vm1, %v5959_v28  ;;  %4993 = vmatmul.mubr.msk.f32.gmra.mrb[4].mxu0 %vm265_vm1, %v5845_v57  ;;  %v5987_v57 = vld [vmem:[%s5470_s28 + $0x128] sm:$0xff] }
  0x7e   : > { %4769 = vmatprep.mubr.msk.f32.mxu1 %vm265_vm1, %v5962_v5  ;;  %4995 = vmatprep.mubr.msk.f32.mxu0 %vm265_vm1, %v5851_v51  ;;  %v5990_v51 = vld [vmem:[%s5470_s28 + $0x138] sm:$0xff] }
  0x81   : > { %4770 = vmatmul.mubr.msk.f32.gmra.mrb[22].mxu1 %vm265_vm1, %v5973_v7  ;;  %4996 = vmatmul.mubr.msk.f32.gmra.mrb[6].mxu0 %vm265_vm1, %v5865_v47  ;;  %v6001_v47 = vld [vmem:[%s5470_s28 + $0x140] sm:$0xff] }
  0x82   : > { %4772 = vmatprep.mubr.msk.f32.mxu1 %vm265_vm1, %v5976_v10  ;;  %4998 = vmatprep.mubr.msk.f32.mxu0 %vm265_vm1, %v5871_v43  ;;  %v6004_v43 = vld [vmem:[%s5470_s28 + $0x150] sm:$0xff] }
  0x85   : > { %4773 = vmatmul.mubr.msk.f32.gmra.mrb[24].mxu1 %vm265_vm1, %v5987_v57  ;;  %4999 = vmatmul.mubr.msk.f32.gmra.mrb[8].mxu0 %vm265_vm1, %v5885_v39  ;;  %v6015_v39 = vld [vmem:[%s5470_s28 + $0x158] sm:$0xff] }
  0x86   : > { %4775 = vmatprep.mubr.msk.f32.mxu1 %vm265_vm1, %v5990_v51  ;;  %5001 = vmatprep.mubr.msk.f32.mxu0 %vm265_vm1, %v5891_v35  ;;  %v6018_v35 = vld [vmem:[%s5470_s28 + $0x168] sm:$0xff] }
  0x89   : > { %4776 = vmatmul.mubr.msk.f32.gmra.mrb[26].mxu1 %vm265_vm1, %v6001_v47  ;;  %5002 = vmatmul.mubr.msk.f32.gmra.mrb[10].mxu0 %vm265_vm1, %v5905_v62  ;;  %v6029_v62 = vld [vmem:[%s5470_s28 + $0x170] sm:$0xff] }
  0x8a   : > { %4778 = vmatprep.mubr.msk.f32.mxu1 %vm265_vm1, %v6004_v43  ;;  %5004 = vmatprep.mubr.msk.f32.mxu0 %vm265_vm1, %v5911_v59 }
  0x8d   : > { %4779 = vmatmul.mubr.msk.f32.gmra.mrb[28].mxu1 %vm265_vm1, %v6015_v39  ;;  %5005 = vmatmul.mubr.msk.f32.gmra.mrb[12].mxu0 %vm265_vm1, %v5922_v33  ;;  %v916_v33 = vld [vmem:[%s5470_s28 + $0xa] sm:$0xff] }
  0x8e   : > { %4781 = vmatprep.mubr.msk.f32.mxu1 %vm265_vm1, %v6018_v35  ;;  %5007 = vmatprep.mubr.msk.f32.mxu0 %vm265_vm1, %v5925_v29 }
  0x91   : > { %4782 = vmatmul.mubr.msk.f32.gmra.mrb[30].mxu1 %vm265_vm1, %v6029_v62  ;;  %5008 = vmatmul.mubr.msk.f32.gmra.mrb[14].mxu0 %vm265_vm1, %v5941_v31 }
  0x92   : > { %4786 = vmatprep.mubr.msk.f32.mxu1 %vm265_vm1, %v915_v3  ;;  %5010 = vmatprep.mubr.msk.f32.mxu0 %vm265_vm1, %v5946_v0  ;;  %v6643_v3 = vld [vmem:[#allocation22_spill] sm:$0xff] }
  0x95   : > { %4787 = vmatmul.mubr.msk.f32.vlgmr.msra.gmra.mrb[0].mxu1 %vm265_vm1, %v916_v33  ;;  %5011 = vmatmul.mubr.msk.f32.gmra.mrb[16].mxu0 %vm265_vm1, %v5959_v28  ;;  %v4214_v33 = vld [vmem:[%s5470_s28 + $0x198] sm:$0xff] }
  0x96   : > { %4835 = vmatpush3.msk.msra.mxu1 %vm362_vm0, %v5771_v61  ;;  %4789 = vmatprep.mubr.msk.f32.mxu1 %vm265_vm1, %v5586_v24  ;;  %v6084_v24 = vld [vmem:[%s5470_s28 + $0x180] sm:$0xff] }
  0x97   : > { %5013 = vmatprep.mubr.msk.f32.mxu0 %vm265_vm1, %v5962_v5  ;;  %5134 = vmatprep.subr.msk.mxu1 %vm362_vm0, %v5448_v1  ;;  %v4215_v61 = vld [vmem:[%s5470_s28 + $0x1a0] sm:$0xff] }
  0x99   : > { %4790 = vmatmul.mubr.msk.f32.gmra.mrb[2].mxu1 %vm265_vm1, %v5597_v25  ;;  %5014 = vmatmul.mubr.msk.f32.gmra.mrb[18].mxu0 %vm265_vm1, %v5973_v7  ;;  %v6095_v25 = vld [vmem:[%s5470_s28 + $0x188] sm:$0xff] }
  0x9a   : > { %4792 = vmatprep.mubr.msk.f32.mxu1 %vm265_vm1, %v5603_v27  ;;  %5016 = vmatprep.mubr.msk.f32.mxu0 %vm265_vm1, %v5976_v10 }
  0x9d   : > { %4793 = vmatmul.mubr.msk.f32.gmra.mrb[4].mxu1 %vm265_vm1, %v5621_v30  ;;  %5017 = vmatmul.mubr.msk.f32.gmra.mrb[20].mxu0 %vm265_vm1, %v5987_v57 }
  0x9e   : > { %4795 = vmatprep.mubr.msk.f32.mxu1 %vm265_vm1, %v5629_v32  ;;  %5019 = vmatprep.mubr.msk.f32.mxu0 %vm265_vm1, %v5990_v51 }
  0xa1   : > { %4796 = vmatmul.mubr.msk.f32.gmra.mrb[6].mxu1 %vm265_vm1, %v5645_v34  ;;  %5020 = vmatmul.mubr.msk.f32.gmra.mrb[22].mxu0 %vm265_vm1, %v6001_v47 }
  0xa2   : > { %4798 = vmatprep.mubr.msk.f32.mxu1 %vm265_vm1, %v5651_v36  ;;  %5022 = vmatprep.mubr.msk.f32.mxu0 %vm265_vm1, %v6004_v43 }
  0xa5   : > { %4799 = vmatmul.mubr.msk.f32.gmra.mrb[8].mxu1 %vm265_vm1, %v5665_v38  ;;  %5023 = vmatmul.mubr.msk.f32.gmra.mrb[24].mxu0 %vm265_vm1, %v6015_v39 }
  0xa6   : > { %4801 = vmatprep.mubr.msk.f32.mxu1 %vm265_vm1, %v5671_v40  ;;  %5025 = vmatprep.mubr.msk.f32.mxu0 %vm265_vm1, %v6018_v35 }
  0xa9   : > { %4802 = vmatmul.mubr.msk.f32.gmra.mrb[10].mxu1 %vm265_vm1, %v5685_v42  ;;  %5026 = vmatmul.mubr.msk.f32.gmra.mrb[26].mxu0 %vm265_vm1, %v6029_v62 }
  0xaa   : > { %4804 = vmatprep.mubr.msk.f32.mxu1 %vm265_vm1, %v5691_v44  ;;  %5028 = vmatprep.mubr.msk.f32.mxu0 %vm265_vm1, %v6084_v24 }
  0xad   : > { %4805 = vmatmul.mubr.msk.f32.gmra.mrb[12].mxu1 %vm265_vm1, %v5705_v46  ;;  %5029 = vmatmul.mubr.msk.f32.gmra.mrb[28].mxu0 %vm265_vm1, %v6095_v25 }
  0xae   : > { %4807 = vmatprep.mubr.msk.f32.mxu1 %vm265_vm1, %v5711_v48  ;;  %5031 = vmatprep.mubr.msk.f32.mxu0 %vm265_vm1, %v4214_v33  ;;  %v6644_v33 = vld [vmem:[#allocation10_spill] sm:$0xff] }
  0xb1   : > { %4808 = vmatmul.mubr.msk.f32.gmra.mrb[14].mxu1 %vm265_vm1, %v5725_v50  ;;  %5032 = vmatmul.mubr.msk.f32.gmra.mrb[30].mxu0 %vm265_vm1, %v4215_v61  ;;  %v6645_v61 = vld [vmem:[#allocation23_spill] sm:$0xff] }
  0xb2   : > { %4810 = vmatprep.mubr.msk.f32.mxu1 %vm265_vm1, %v5731_v52  ;;  %5036 = vmatprep.mubr.msk.f32.mxu0 %vm265_vm1, %v5479_v8  ;;  %v6627_v8 = vld [vmem:[#allocation27_spill] sm:$0xff] }
  0xb5   : > { %4811 = vmatmul.mubr.msk.f32.gmra.mrb[16].mxu1 %vm265_vm1, %v5745_v54  ;;  %5037 = vmatmul.mubr.msk.f32.vlgmr.msra.gmra.mrb[0].mxu0 %vm265_vm1, %v5494_v11  ;;  %v6628_v11 = vld [vmem:[#allocation2_spill] sm:$0xff] }
  0xb6   : > { %5085 = vmatpush3.msk.msra.mxu0 %vm362_vm0, %v5930_v37  ;;  %4813 = vmatprep.mubr.msk.f32.mxu1 %vm265_vm1, %v5749_v56  ;;  %v6642_v37 = vld [vmem:[#allocation9_spill] sm:$0xff] }
  0xb7   : > { %5039 = vmatprep.mubr.msk.f32.mxu0 %vm265_vm1, %v5500_v12  ;;  %v6629_v12 = vld [vmem:[#allocation15_spill] sm:$0xff] }
  0xb9   : > { %4814 = vmatmul.mubr.msk.f32.gmra.mrb[18].mxu1 %vm265_vm1, %v5760_v58  ;;  %5040 = vmatmul.mubr.msk.f32.gmra.mrb[2].mxu0 %vm265_vm1, %v5513_v13  ;;  %v6630_v13 = vld [vmem:[#allocation3_spill] sm:$0xff] }
  0xba   : > { %4816 = vmatprep.mubr.msk.f32.mxu1 %vm265_vm1, %v5766_v60  ;;  %5042 = vmatprep.mubr.msk.f32.mxu0 %vm265_vm1, %v5516_v14  ;;  %v6631_v14 = vld [vmem:[#allocation16_spill] sm:$0xff] }
  0xbd   : > { %4817 = vmatmul.mubr.msk.f32.gmra.mrb[20].mxu1 %vm265_vm1, %v5784_v63  ;;  %5043 = vmatmul.mubr.msk.f32.gmra.mrb[4].mxu0 %vm265_vm1, %v5527_v15  ;;  %v6632_v15 = vld [vmem:[#allocation4_spill] sm:$0xff] }
  0xbe   : > { %4819 = vmatprep.mubr.msk.f32.mxu1 %vm265_vm1, %v5792_v2  ;;  %5045 = vmatprep.mubr.msk.f32.mxu0 %vm265_vm1, %v5530_v16  ;;  %v6633_v16 = vld [vmem:[#allocation17_spill] sm:$0xff] }
  0xc1   : > { %4820 = vmatmul.mubr.msk.f32.gmra.mrb[22].mxu1 %vm265_vm1, %v5808_v4  ;;  %5046 = vmatmul.mubr.msk.f32.gmra.mrb[6].mxu0 %vm265_vm1, %v5541_v17  ;;  %v6634_v17 = vld [vmem:[#allocation5_spill] sm:$0xff] }
  0xc2   : > { %4822 = vmatprep.mubr.msk.f32.mxu1 %vm265_vm1, %v5814_v6  ;;  %5048 = vmatprep.mubr.msk.f32.mxu0 %vm265_vm1, %v5544_v18  ;;  %v6635_v18 = vld [vmem:[#allocation18_spill] sm:$0xff] }
  0xc5   : > { %4823 = vmatmul.mubr.msk.f32.gmra.mrb[24].mxu1 %vm265_vm1, %v5828_v9  ;;  %5049 = vmatmul.mubr.msk.f32.gmra.mrb[8].mxu0 %vm265_vm1, %v5555_v19  ;;  %v6636_v19 = vld [vmem:[#allocation6_spill] sm:$0xff] }
  0xc6   : > { %4825 = vmatprep.mubr.msk.f32.mxu1 %vm265_vm1, %v5834_v55  ;;  %5051 = vmatprep.mubr.msk.f32.mxu0 %vm265_vm1, %v5558_v20  ;;  %v6637_v20 = vld [vmem:[#allocation19_spill] sm:$0xff] }
  0xc9   : > { %4826 = vmatmul.mubr.msk.f32.gmra.mrb[26].mxu1 %vm265_vm1, %v5848_v53  ;;  %5052 = vmatmul.mubr.msk.f32.gmra.mrb[10].mxu0 %vm265_vm1, %v5569_v21  ;;  %v6638_v21 = vld [vmem:[#allocation7_spill] sm:$0xff] }
  0xca   : > { %4828 = vmatprep.mubr.msk.f32.mxu1 %vm265_vm1, %v5854_v49  ;;  %5054 = vmatprep.mubr.msk.f32.mxu0 %vm265_vm1, %v5572_v22  ;;  %v6640_v22 = vld [vmem:[#allocation8_spill] sm:$0xff] }
  0xcd   : > { %4829 = vmatmul.mubr.msk.f32.gmra.mrb[28].mxu1 %vm265_vm1, %v5868_v45  ;;  %5055 = vmatmul.mubr.msk.f32.gmra.mrb[12].mxu0 %vm265_vm1, %v5583_v23  ;;  %v6641_v23 = vld [vmem:[#allocation21_spill] sm:$0xff] }
  0xce   : > { %4831 = vmatprep.mubr.msk.f32.mxu1 %vm265_vm1, %v5874_v41  ;;  %5057 = vmatprep.mubr.msk.f32.mxu0 %vm265_vm1, %v5600_v26 }
  0xd1   : > { %4832 = vmatmul.mubr.msk.f32.gmra.mrb[30].mxu1 %vm265_vm1, %v6627_v8  ;;  %5058 = vmatmul.mubr.msk.f32.gmra.mrb[14].mxu0 %vm265_vm1, %v6628_v11  ;;  %v6654_v8 = vld [vmem:[#allocation30_spill] sm:$0xff] }
  0xd2   : > { %4836 = vmatprep.mubr.msk.f32.mxu1 %vm265_vm1, %v6629_v12  ;;  %5060 = vmatprep.mubr.msk.f32.mxu0 %vm265_vm1, %v6630_v13  ;;  %v6646_v12 = vld [vmem:[#allocation11_spill] sm:$0xff] }
  0xd5   : > { %4837 = vmatmul.mubr.msk.f32.vlgmr.msra.gmra.mrb[0].mxu1 %vm265_vm1, %v6631_v14  ;;  %5061 = vmatmul.mubr.msk.f32.gmra.mrb[16].mxu0 %vm265_vm1, %v6632_v15  ;;  %v6647_v14 = vld [vmem:[#allocation24_spill] sm:$0xff] }
  0xd6   : > { %5135 = vmatpush3.msk.msra.mxu1 %vm362_vm0, %v5448_v1  ;;  %4839 = vmatprep.mubr.msk.f32.mxu1 %vm265_vm1, %v6633_v16  ;;  %v6639_v1 = vld [vmem:[#allocation20_spill] sm:$0xff] }
  0xd7   : > { %5063 = vmatprep.mubr.msk.f32.mxu0 %vm265_vm1, %v6634_v17  ;;  %v6648_v16 = vld [vmem:[#allocation12_spill] sm:$0xff] }
  0xd9   : > { %4840 = vmatmul.mubr.msk.f32.gmra.mrb[2].mxu1 %vm265_vm1, %v6635_v18  ;;  %5064 = vmatmul.mubr.msk.f32.gmra.mrb[18].mxu0 %vm265_vm1, %v6636_v19  ;;  %v6649_v18 = vld [vmem:[#allocation25_spill] sm:$0xff] }
  0xda   : > { %4842 = vmatprep.mubr.msk.f32.mxu1 %vm265_vm1, %v6637_v20  ;;  %5066 = vmatprep.mubr.msk.f32.mxu0 %vm265_vm1, %v6638_v21  ;;  %v6650_v20 = vld [vmem:[#allocation13_spill] sm:$0xff] }
  0xdd   : > { %4843 = vmatmul.mubr.msk.f32.gmra.mrb[4].mxu1 %vm265_vm1, %v6639_v1  ;;  %5067 = vmatmul.mubr.msk.f32.gmra.mrb[20].mxu0 %vm265_vm1, %v6640_v22  ;;  %v6222_v1 = vld [vmem:[%s5470_s28 + $0x181] sm:$0xff] }
  0xde   : > { %4845 = vmatprep.mubr.msk.f32.mxu1 %vm265_vm1, %v6641_v23  ;;  %5069 = vmatprep.mubr.msk.f32.mxu0 %vm265_vm1, %v6642_v37  ;;  %v6651_v23 = vld [vmem:[#allocation26_spill] sm:$0xff] }
  0xe1   : > { %4846 = vmatmul.mubr.msk.f32.gmra.mrb[6].mxu1 %vm265_vm1, %v6643_v3  ;;  %5070 = vmatmul.mubr.msk.f32.gmra.mrb[22].mxu0 %vm265_vm1, %v6644_v33  ;;  %v6652_v3 = vld [vmem:[#allocation14_spill] sm:$0xff] }
  0xe2   : > { %4848 = vmatprep.mubr.msk.f32.mxu1 %vm265_vm1, %v6645_v61  ;;  %5072 = vmatprep.mubr.msk.f32.mxu0 %vm265_vm1, %v6646_v12  ;;  %v6653_v61 = vld [vmem:[#allocation28_spill] sm:$0xff] }
  0xe5   : > { %4849 = vmatmul.mubr.msk.f32.gmra.mrb[8].mxu1 %vm265_vm1, %v6647_v14  ;;  %5073 = vmatmul.mubr.msk.f32.gmra.mrb[24].mxu0 %vm265_vm1, %v6648_v16  ;;  %v6233_v14 = vld [vmem:[%s5470_s28 + $0x189] sm:$0xff] }
  0xe6   : > { %4851 = vmatprep.mubr.msk.f32.mxu1 %vm265_vm1, %v6649_v18  ;;  %5075 = vmatprep.mubr.msk.f32.mxu0 %vm265_vm1, %v6650_v20  ;;  %v4280_v18 = vld [vmem:[%s5470_s28 + $0x199] sm:$0xff] }
  0xe9   : > { %4852 = vmatmul.mubr.msk.f32.gmra.mrb[10].mxu1 %vm265_vm1, %v6651_v23  ;;  %5076 = vmatmul.mubr.msk.f32.gmra.mrb[26].mxu0 %vm265_vm1, %v6652_v3  ;;  %v4281_v23 = vld [vmem:[%s5470_s28 + $0x1a1] sm:$0xff]  ;;  %v6655_v3 = vld [vmem:[#allocation32_spill] sm:$0xff] }
  0xea   : > { %4854 = vmatprep.mubr.msk.f32.mxu1 %vm265_vm1, %v6653_v61  ;;  %5078 = vmatprep.mubr.msk.f32.mxu0 %vm265_vm1, %v6222_v1 }
  0xed   : > { %4855 = vmatmul.mubr.msk.f32.gmra.mrb[12].mxu1 %vm265_vm1, %v6654_v8  ;;  %5079 = vmatmul.mubr.msk.f32.gmra.mrb[28].mxu0 %vm265_vm1, %v6233_v14 }
  0xee   : > { %4857 = vmatprep.mubr.msk.f32.mxu1 %vm265_vm1, %v5911_v59  ;;  %5081 = vmatprep.mubr.msk.f32.mxu0 %vm265_vm1, %v4280_v18 }
  0xf1   : > { %4858 = vmatmul.mubr.msk.f32.gmra.mrb[14].mxu1 %vm265_vm1, %v6655_v3  ;;  %5082 = vmatmul.mubr.msk.f32.gmra.mrb[30].mxu0 %vm265_vm1, %v4281_v23 }
  0xf2   : > { %4860 = vmatprep.mubr.msk.f32.mxu1 %vm265_vm1, %v5925_v29  ;;  %5086 = vmatprep.mubr.msk.f32.mxu0 %vm265_vm1, %v5603_v27  ;;  %v6657_v27 = vld [vmem:[#allocation29_spill] sm:$0xff] }
  0xf3   : > { %v4346_v29 = vld [vmem:[%s5470_s28 + $0x19a] sm:$0xff] }
  0xf5   : > { %4861 = vmatmul.mubr.msk.f32.gmra.mrb[16].mxu1 %vm265_vm1, %v5941_v31  ;;  %5087 = vmatmul.mubr.msk.f32.vlgmr.msra.gmra.mrb[0].mxu0 %vm265_vm1, %v5621_v30  ;;  %v6658_v30 = vld [vmem:[#allocation14_spill] sm:$0xff]  ;;  %v6659_v31 = vld [vmem:[#allocation31_spill] sm:$0xff] }
  0xf6   : > { %4863 = vmatprep.mubr.msk.f32.mxu1 %vm265_vm1, %v5946_v0  ;;  %5089 = vmatprep.mubr.msk.f32.mxu0 %vm265_vm1, %v5629_v32  ;;  %v4347_v32 = vld [vmem:[%s5470_s28 + $0x1a2] sm:$0xff] }
  0xf9   : > { %4864 = vmatmul.mubr.msk.f32.gmra.mrb[18].mxu1 %vm265_vm1, %v5959_v28  ;;  %5090 = vmatmul.mubr.msk.f32.gmra.mrb[2].mxu0 %vm265_vm1, %v5645_v34 }
  0xfa   : > { %4866 = vmatprep.mubr.msk.f32.mxu1 %vm265_vm1, %v5962_v5  ;;  %5092 = vmatprep.mubr.msk.f32.mxu0 %vm265_vm1, %v5651_v36 }
  0xfd   : > { %4867 = vmatmul.mubr.msk.f32.gmra.mrb[20].mxu1 %vm265_vm1, %v5973_v7  ;;  %5093 = vmatmul.mubr.msk.f32.gmra.mrb[4].mxu0 %vm265_vm1, %v5665_v38 }
  0xfe   : > { %4869 = vmatprep.mubr.msk.f32.mxu1 %vm265_vm1, %v5976_v10  ;;  %5095 = vmatprep.mubr.msk.f32.mxu0 %vm265_vm1, %v5671_v40 }
 0x101   : > { %4870 = vmatmul.mubr.msk.f32.gmra.mrb[22].mxu1 %vm265_vm1, %v5987_v57  ;;  %5096 = vmatmul.mubr.msk.f32.gmra.mrb[6].mxu0 %vm265_vm1, %v5685_v42 }
 0x102   : > { %4872 = vmatprep.mubr.msk.f32.mxu1 %vm265_vm1, %v5990_v51  ;;  %5098 = vmatprep.mubr.msk.f32.mxu0 %vm265_vm1, %v5691_v44 }
 0x105   : > { %4873 = vmatmul.mubr.msk.f32.gmra.mrb[24].mxu1 %vm265_vm1, %v6001_v47  ;;  %5099 = vmatmul.mubr.msk.f32.gmra.mrb[8].mxu0 %vm265_vm1, %v5705_v46 }
 0x106   : > { %4875 = vmatprep.mubr.msk.f32.mxu1 %vm265_vm1, %v6004_v43  ;;  %5101 = vmatprep.mubr.msk.f32.mxu0 %vm265_vm1, %v5711_v48 }
 0x109   : > { %4876 = vmatmul.mubr.msk.f32.gmra.mrb[26].mxu1 %vm265_vm1, %v6015_v39  ;;  %5102 = vmatmul.mubr.msk.f32.gmra.mrb[10].mxu0 %vm265_vm1, %v5725_v50 }
 0x10a   : > { %4878 = vmatprep.mubr.msk.f32.mxu1 %vm265_vm1, %v6018_v35  ;;  %5104 = vmatprep.mubr.msk.f32.mxu0 %vm265_vm1, %v5731_v52  ;;  %v6394_v52 = vld [vmem:[%s6548_s2] ss:$0 sm:$0xff] }
 0x10d   : > { %4879 = vmatmul.mubr.msk.f32.gmra.mrb[28].mxu1 %vm265_vm1, %v6029_v62  ;;  %5105 = vmatmul.mubr.msk.f32.gmra.mrb[12].mxu0 %vm265_vm1, %v5745_v54 }
 0x10e   : > { %4881 = vmatprep.mubr.msk.f32.mxu1 %vm265_vm1, %v6084_v24  ;;  %5107 = vmatprep.mubr.msk.f32.mxu0 %vm265_vm1, %v5749_v56  ;;  %v6400_v56 = vld [vmem:[%s6549_s3] ss:$0 sm:$0xff] }
 0x111   : > { %4882 = vmatmul.mubr.msk.f32.gmra.mrb[30].mxu1 %vm265_vm1, %v6095_v25  ;;  %5108 = vmatmul.mubr.msk.f32.gmra.mrb[14].mxu0 %vm265_vm1, %v5760_v58 }
 0x112   : > { %4910 = vmatprep.mubr.msk.f32.mxu1 %vm265_vm1, %v5600_v26  ;;  %5110 = vmatprep.mubr.msk.f32.mxu0 %vm265_vm1, %v5766_v60  ;;  %v6656_v26 = vld [vmem:[#allocation27_spill] sm:$0xff] }
 0x115   : > { %4911 = vmatmul.mubr.msk.f32.vlgmr.msra.gmra.mrb[16].mxu1 %vm265_vm1, %v6628_v11  ;;  %5111 = vmatmul.mubr.msk.f32.gmra.mrb[16].mxu0 %vm265_vm1, %v5784_v63 }
 0x116   : > { %4913 = vmatprep.mubr.msk.f32.mxu1 %vm265_vm1, %v6630_v13  ;;  %5113 = vmatprep.mubr.msk.f32.mxu0 %vm265_vm1, %v5792_v2 }
 0x119   : > { %4914 = vmatmul.mubr.msk.f32.gmra.mrb[18].mxu1 %vm265_vm1, %v6632_v15  ;;  %5114 = vmatmul.mubr.msk.f32.gmra.mrb[18].mxu0 %vm265_vm1, %v5808_v4 }
 0x11a   : > { %4916 = vmatprep.mubr.msk.f32.mxu1 %vm265_vm1, %v6634_v17  ;;  %5116 = vmatprep.mubr.msk.f32.mxu0 %vm265_vm1, %v5814_v6 }
 0x11d   : > { %4917 = vmatmul.mubr.msk.f32.gmra.mrb[20].mxu1 %vm265_vm1, %v6636_v19  ;;  %5117 = vmatmul.mubr.msk.f32.gmra.mrb[20].mxu0 %vm265_vm1, %v5828_v9 }
 0x11e   : > { %4919 = vmatprep.mubr.msk.f32.mxu1 %vm265_vm1, %v6638_v21  ;;  %5119 = vmatprep.mubr.msk.f32.mxu0 %vm265_vm1, %v5834_v55 }
 0x121   : > { %4920 = vmatmul.mubr.msk.f32.gmra.mrb[22].mxu1 %vm265_vm1, %v6640_v22  ;;  %5120 = vmatmul.mubr.msk.f32.gmra.mrb[22].mxu0 %vm265_vm1, %v5848_v53 }
 0x122   : > { %4922 = vmatprep.mubr.msk.f32.mxu1 %vm265_vm1, %v6642_v37  ;;  %5122 = vmatprep.mubr.msk.f32.mxu0 %vm265_vm1, %v5854_v49 }
 0x125   : > { %4923 = vmatmul.mubr.msk.f32.gmra.mrb[24].mxu1 %vm265_vm1, %v6644_v33  ;;  %5123 = vmatmul.mubr.msk.f32.gmra.mrb[24].mxu0 %vm265_vm1, %v5868_v45 }
 0x126   : > { %4925 = vmatprep.mubr.msk.f32.mxu1 %vm265_vm1, %v6646_v12  ;;  %5125 = vmatprep.mubr.msk.f32.mxu0 %vm265_vm1, %v5874_v41 }
 0x129   : > { %4926 = vmatmul.mubr.msk.f32.gmra.mrb[26].mxu1 %vm265_vm1, %v6648_v16  ;;  %5126 = vmatmul.mubr.msk.f32.gmra.mrb[26].mxu0 %vm265_vm1, %v6656_v26 }
 0x12a   : > { %4928 = vmatprep.mubr.msk.f32.mxu1 %vm265_vm1, %v6650_v20  ;;  %5128 = vmatprep.mubr.msk.f32.mxu0 %vm265_vm1, %v6657_v27 }
 0x12d   : > { %4929 = vmatmul.mubr.msk.f32.gmra.mrb[28].mxu1 %vm265_vm1, %v6658_v30  ;;  %5129 = vmatmul.mubr.msk.f32.gmra.mrb[28].mxu0 %vm265_vm1, %v6659_v31 }
 0x12e   : > { %4931 = vmatprep.mubr.msk.f32.mxu1 %vm265_vm1, %v6222_v1  ;;  %5131 = vmatprep.mubr.msk.f32.mxu0 %vm265_vm1, %v4346_v29 }
 0x131   : > { %4932 = vmatmul.mubr.msk.f32.gmra.mrb[30].mxu1 %vm265_vm1, %v6233_v14  ;;  %5132 = vmatmul.mubr.msk.f32.gmra.mrb[30].mxu0 %vm265_vm1, %v4347_v32 }
 0x1a8   : > { %v4838_v34 = vpop.f32.mrb[0].mxu1 }
 0x1a9   : > { %v1505_v35 = vpop.f32.mrb[1].mxu1 }
 0x1ac   : > { %v4841_v36 = vpop.f32.mrb[2].mxu1 }
 0x1ad   : > { %v1515_v38 = vpop.f32.mrb[3].mxu1 }
 0x1b0   : > { %v4844_v39 = vpop.f32.mrb[4].mxu1 }
 0x1b1   : > { %v1525_v40 = vpop.f32.mrb[5].mxu1 }
 0x1b4   : > { %v4847_v41 = vpop.f32.mrb[6].mxu1 }
 0x1b5   : > { %v1535_v42 = vpop.f32.mrb[7].mxu1 }
 0x1b8   : > { %v6375_v43 = vpop.f32.mrb[8].mxu1 }
 0x1b9   : > { %v6377_v44 = vpop.f32.mrb[9].mxu1 }
 0x1bc   : > { %v6379_v45 = vpop.f32.mrb[10].mxu1 }
 0x1bd   : > { %v6381_v46 = vpop.f32.mrb[11].mxu1 }
 0x1c0   : > { %v6383_v47 = vpop.f32.mrb[12].mxu1 }
 0x1c1   : > { %v6385_v48 = vpop.f32.mrb[13].mxu1 }
 0x1c4   : > { %v6387_v49 = vpop.f32.mrb[14].mxu1 }
 0x1c5   : > { %v6389_v50 = vpop.f32.mrb[15].mxu1 }
 0x1c8   : > { %v5088_v51 = vpop.f32.mrb[0].mxu0 }
 0x1c9   : > { %v5136_v53 = vadd.f32 %v5088_v51, %v4838_v34  ;;  %v3456_v54 = vpop.f32.mrb[1].mxu0 }
 0x1ca   : > { %v5137_v58 = vadd.f32 %v3456_v54, %v1505_v35 }
 0x1cb   : > { %v3655_v59 = vadd.f32 %v5136_v53, %v6394_v52 }
 0x1cc   : > { %v3654_v60 = vadd.f32 %v5137_v58, %v6394_v52  ;;  %v5091_v62 = vpop.f32.mrb[2].mxu0 }
 0x1cd   : > { %vm3687_vm2 = vcmp.ge.f32.partialorder %v3655_v59, 0.0  ;;  %v3726_v63 = vmul.f32 %v6400_v56, %v3655_v59  ;;  %v5138_v0 = vadd.f32 %v5091_v62, %v4841_v36  ;;  %v3466_v2 = vpop.f32.mrb[3].mxu0 }
 0x1ce   : > { %vm3686_vm4 = vcmp.ge.f32.partialorder %v3654_v60, 0.0  ;;  %v3725_v4 = vmul.f32 %v6400_v56, %v3654_v60  ;;  %v5139_v5 = vadd.f32 %v3466_v2, %v1515_v38 }
 0x1cf   : > { %v3758_v6 = vsel %vm3687_vm2, %v3655_v59, %v3726_v63  ;;  %v3657_v7 = vadd.f32 %v5138_v0, %v6394_v52 }
 0x1d0   : > { %3791 = vst.msk [vmem:[%s6407_s22 + $0x8] sm:$0xff] %vm3789_vm3, %v3758_v6  ;;  %v3757_v9 = vsel %vm3686_vm4, %v3654_v60, %v3725_v4  ;;  %v3656_v10 = vadd.f32 %v5139_v5, %v6394_v52  ;;  %v5094_v55 = vpop.f32.mrb[4].mxu0 }
 0x1d1   : > { %3790 = vst.msk [vmem:[%s6407_s22] sm:$0xff] %vm3789_vm3, %v3757_v9  ;;  %vm3689_vm5 = vcmp.ge.f32.partialorder %v3657_v7, 0.0  ;;  %v3728_v57 = vmul.f32 %v6400_v56, %v3657_v7  ;;  %v5140_v28 = vadd.f32 %v5094_v55, %v4844_v39  ;;  %v3476_v24 = vpop.f32.mrb[5].mxu0 }
 0x1d2   : > { %vm3688_vm6 = vcmp.ge.f32.partialorder %v3656_v10, 0.0  ;;  %v3727_v25 = vmul.f32 %v6400_v56, %v3656_v10  ;;  %v5141_v8 = vadd.f32 %v3476_v24, %v1525_v40 }
 0x1d3   : > { %v3760_v11 = vsel %vm3689_vm5, %v3657_v7, %v3728_v57  ;;  %v3659_v13 = vadd.f32 %v5140_v28, %v6394_v52 }
 0x1d4   : > { %3793 = vst.msk [vmem:[%s6407_s22 + $0x18] sm:$0xff] %vm3789_vm3, %v3760_v11  ;;  %v3759_v15 = vsel %vm3688_vm6, %v3656_v10, %v3727_v25  ;;  %v3658_v17 = vadd.f32 %v5141_v8, %v6394_v52  ;;  %v5097_v19 = vpop.f32.mrb[6].mxu0 }
 0x1d5   : > { %3792 = vst.msk [vmem:[%s6407_s22 + $0x10] sm:$0xff] %vm3789_vm3, %v3759_v15  ;;  %vm3691_vm7 = vcmp.ge.f32.partialorder %v3659_v13, 0.0  ;;  %v3730_v21 = vmul.f32 %v6400_v56, %v3659_v13  ;;  %v5142_v22 = vadd.f32 %v5097_v19, %v4847_v41  ;;  %v3486_v37 = vpop.f32.mrb[7].mxu0 }
 0x1d6   : > { %vm3690_vm8 = vcmp.ge.f32.partialorder %v3658_v17, 0.0  ;;  %v3729_v33 = vmul.f32 %v6400_v56, %v3658_v17  ;;  %v5143_v12 = vadd.f32 %v3486_v37, %v1535_v42 }
 0x1d7   : > { %v3762_v16 = vsel %vm3691_vm7, %v3659_v13, %v3730_v21  ;;  %v3661_v20 = vadd.f32 %v5142_v22, %v6394_v52 }
 0x1d8   : > { %3795 = vst.msk [vmem:[%s6407_s22 + $0x28] sm:$0xff] %vm3789_vm3, %v3762_v16  ;;  %v3761_v1 = vsel %vm3690_vm8, %v3658_v17, %v3729_v33  ;;  %v3660_v3 = vadd.f32 %v5143_v12, %v6394_v52  ;;  %v5100_v61 = vpop.f32.mrb[8].mxu0 }
 0x1d9   : > { %3794 = vst.msk [vmem:[%s6407_s22 + $0x20] sm:$0xff] %vm3789_vm3, %v3761_v1  ;;  %vm3693_vm9 = vcmp.ge.f32.partialorder %v3661_v20, 0.0  ;;  %v3732_v14 = vmul.f32 %v6400_v56, %v3661_v20  ;;  %v5144_v18 = vadd.f32 %v5100_v61, %v6375_v43  ;;  %v3496_v23 = vpop.f32.mrb[9].mxu0 }
 0x1da   : > { %vm3692_vm10 = vcmp.ge.f32.partialorder %v3660_v3, 0.0  ;;  %v3731_v26 = vmul.f32 %v6400_v56, %v3660_v3  ;;  %v5145_v27 = vadd.f32 %v3496_v23, %v6377_v44 }
 0x1db   : > { %v3764_v29 = vsel %vm3693_vm9, %v3661_v20, %v3732_v14  ;;  %v3663_v30 = vadd.f32 %v5144_v18, %v6394_v52 }
 0x1dc   : > { %3797 = vst.msk [vmem:[%s6407_s22 + $0x38] sm:$0xff] %vm3789_vm3, %v3764_v29  ;;  %v3763_v31 = vsel %vm3692_vm10, %v3660_v3, %v3731_v26  ;;  %v3662_v32 = vadd.f32 %v5145_v27, %v6394_v52  ;;  %v5103_v34 = vpop.f32.mrb[10].mxu0 }
 0x1dd   : > { %3796 = vst.msk [vmem:[%s6407_s22 + $0x30] sm:$0xff] %vm3789_vm3, %v3763_v31  ;;  %vm3695_vm11 = vcmp.ge.f32.partialorder %v3663_v30, 0.0  ;;  %v3734_v35 = vmul.f32 %v6400_v56, %v3663_v30  ;;  %v5146_v36 = vadd.f32 %v5103_v34, %v6379_v45  ;;  %v3506_v38 = vpop.f32.mrb[11].mxu0 }
 0x1de   : > { %vm3694_vm12 = vcmp.ge.f32.partialorder %v3662_v32, 0.0  ;;  %v3733_v39 = vmul.f32 %v6400_v56, %v3662_v32  ;;  %v5147_v40 = vadd.f32 %v3506_v38, %v6381_v46 }
 0x1df   : > { %v3766_v41 = vsel %vm3695_vm11, %v3663_v30, %v3734_v35  ;;  %v3665_v42 = vadd.f32 %v5146_v36, %v6394_v52 }
 0x1e0   : > { %3799 = vst.msk [vmem:[%s6407_s22 + $0x48] sm:$0xff] %vm3789_vm3, %v3766_v41  ;;  %v3765_v43 = vsel %vm3694_vm12, %v3662_v32, %v3733_v39  ;;  %v3664_v44 = vadd.f32 %v5147_v40, %v6394_v52  ;;  %v5106_v51 = vpop.f32.mrb[12].mxu0 }
 0x1e1   : > { %3798 = vst.msk [vmem:[%s6407_s22 + $0x40] sm:$0xff] %vm3789_vm3, %v3765_v43  ;;  %vm3697_vm13 = vcmp.ge.f32.partialorder %v3665_v42, 0.0  ;;  %v3736_v45 = vmul.f32 %v6400_v56, %v3665_v42  ;;  %v5148_v53 = vadd.f32 %v5106_v51, %v6383_v47  ;;  %v3516_v54 = vpop.f32.mrb[13].mxu0 }
 0x1e2   : > { %vm3696_vm14 = vcmp.ge.f32.partialorder %v3664_v44, 0.0  ;;  %v3735_v46 = vmul.f32 %v6400_v56, %v3664_v44  ;;  %v5149_v58 = vadd.f32 %v3516_v54, %v6385_v48 }
 0x1e3   : > { %v3768_v59 = vsel %vm3697_vm13, %v3665_v42, %v3736_v45  ;;  %v3667_v60 = vadd.f32 %v5148_v53, %v6394_v52 }
 0x1e4   : > { %3801 = vst.msk [vmem:[%s6407_s22 + $0x58] sm:$0xff] %vm3789_vm3, %v3768_v59  ;;  %v3767_v62 = vsel %vm3696_vm14, %v3664_v44, %v3735_v46  ;;  %v3666_v63 = vadd.f32 %v5149_v58, %v6394_v52  ;;  %v5109_v0 = vpop.f32.mrb[14].mxu0 }
 0x1e5   : > { %3800 = vst.msk [vmem:[%s6407_s22 + $0x50] sm:$0xff] %vm3789_vm3, %v3767_v62  ;;  %vm3699_vm15 = vcmp.ge.f32.partialorder %v3667_v60, 0.0  ;;  %v3738_v47 = vmul.f32 %v6400_v56, %v3667_v60  ;;  %v5150_v2 = vadd.f32 %v5109_v0, %v6387_v49  ;;  %v3526_v4 = vpop.f32.mrb[15].mxu0 }
 0x1e6   : > { %vm3698_vm0 = vcmp.ge.f32.partialorder %v3666_v63, 0.0  ;;  %v3737_v48 = vmul.f32 %v6400_v56, %v3666_v63  ;;  %v5151_v5 = vadd.f32 %v3526_v4, %v6389_v50 }
 0x1e7   : > { %v3770_v6 = vsel %vm3699_vm15, %v3667_v60, %v3738_v47  ;;  %v3669_v7 = vadd.f32 %v5150_v2, %v6394_v52 }
 0x1e8   : > { %3803 = vst.msk [vmem:[%s6407_s22 + $0x68] sm:$0xff] %vm3789_vm3, %v3770_v6  ;;  %v3769_v9 = vsel %vm3698_vm0, %v3666_v63, %v3737_v48  ;;  %v3668_v10 = vadd.f32 %v5151_v5, %v6394_v52  ;;  %v4912_v55 = vpop.f32.mrb[16].mxu1  ;;  %v5112_v57 = vpop.f32.mrb[16].mxu0 }
 0x1e9   : > { %3802 = vst.msk [vmem:[%s6407_s22 + $0x60] sm:$0xff] %vm3789_vm3, %v3769_v9  ;;  %vm3701_vm1 = vcmp.ge.f32.partialorder %v3669_v7, 0.0  ;;  %v3740_v49 = vmul.f32 %v6400_v56, %v3669_v7  ;;  %v5152_v28 = vadd.f32 %v5112_v57, %v4912_v55  ;;  %v1975_v24 = vpop.f32.mrb[17].mxu1  ;;  %v3536_v50 = vpop.f32.mrb[17].mxu0 }
 0x1ea   : > { %vm3700_vm2 = vcmp.ge.f32.partialorder %v3668_v10, 0.0  ;;  %v3739_v25 = vmul.f32 %v6400_v56, %v3668_v10  ;;  %v5153_v8 = vadd.f32 %v3536_v50, %v1975_v24 }
 0x1eb   : > { %v3772_v11 = vsel %vm3701_vm1, %v3669_v7, %v3740_v49  ;;  %v3671_v13 = vadd.f32 %v5152_v28, %v6394_v52 }
 0x1ec   : > { %3805 = vst.msk [vmem:[%s6407_s22 + $0x78] sm:$0xff] %vm3789_vm3, %v3772_v11  ;;  %v3771_v15 = vsel %vm3700_vm2, %v3668_v10, %v3739_v25  ;;  %v3670_v17 = vadd.f32 %v5153_v8, %v6394_v52  ;;  %v4915_v19 = vpop.f32.mrb[18].mxu1  ;;  %v5115_v21 = vpop.f32.mrb[18].mxu0 }
 0x1ed   : > { %3804 = vst.msk [vmem:[%s6407_s22 + $0x70] sm:$0xff] %vm3789_vm3, %v3771_v15  ;;  %vm3703_vm4 = vcmp.ge.f32.partialorder %v3671_v13, 0.0  ;;  %v3742_v22 = vmul.f32 %v6400_v56, %v3671_v13  ;;  %v5154_v37 = vadd.f32 %v5115_v21, %v4915_v19  ;;  %v1985_v33 = vpop.f32.mrb[19].mxu1  ;;  %v3546_v12 = vpop.f32.mrb[19].mxu0 }
 0x1ee   : > { %vm3702_vm5 = vcmp.ge.f32.partialorder %v3670_v17, 0.0  ;;  %v3741_v16 = vmul.f32 %v6400_v56, %v3670_v17  ;;  %v5155_v20 = vadd.f32 %v3546_v12, %v1985_v33 }
 0x1ef   : > { %v3774_v1 = vsel %vm3703_vm4, %v3671_v13, %v3742_v22  ;;  %v3673_v3 = vadd.f32 %v5154_v37, %v6394_v52 }
 0x1f0   : > { %3807 = vst.msk [vmem:[%s6407_s22 + $0x88] sm:$0xff] %vm3789_vm3, %v3774_v1  ;;  %v3773_v61 = vsel %vm3702_vm5, %v3670_v17, %v3741_v16  ;;  %v3672_v14 = vadd.f32 %v5155_v20, %v6394_v52  ;;  %v4918_v18 = vpop.f32.mrb[20].mxu1  ;;  %v5118_v23 = vpop.f32.mrb[20].mxu0 }
 0x1f1   : > { %3806 = vst.msk [vmem:[%s6407_s22 + $0x80] sm:$0xff] %vm3789_vm3, %v3773_v61  ;;  %vm3705_vm6 = vcmp.ge.f32.partialorder %v3673_v3, 0.0  ;;  %v3744_v26 = vmul.f32 %v6400_v56, %v3673_v3  ;;  %v5156_v27 = vadd.f32 %v5118_v23, %v4918_v18  ;;  %v1995_v29 = vpop.f32.mrb[21].mxu1  ;;  %v3556_v30 = vpop.f32.mrb[21].mxu0 }
 0x1f2   : > { %vm3704_vm7 = vcmp.ge.f32.partialorder %v3672_v14, 0.0  ;;  %v3743_v31 = vmul.f32 %v6400_v56, %v3672_v14  ;;  %v5157_v32 = vadd.f32 %v3556_v30, %v1995_v29 }
 0x1f3   : > { %v3776_v34 = vsel %vm3705_vm6, %v3673_v3, %v3744_v26  ;;  %v3675_v35 = vadd.f32 %v5156_v27, %v6394_v52 }
 0x1f4   : > { %3809 = vst.msk [vmem:[%s6407_s22 + $0x98] sm:$0xff] %vm3789_vm3, %v3776_v34  ;;  %v3775_v36 = vsel %vm3704_vm7, %v3672_v14, %v3743_v31  ;;  %v3674_v38 = vadd.f32 %v5157_v32, %v6394_v52  ;;  %v4921_v39 = vpop.f32.mrb[22].mxu1  ;;  %v5121_v40 = vpop.f32.mrb[22].mxu0 }
 0x1f5   : > { %3808 = vst.msk [vmem:[%s6407_s22 + $0x90] sm:$0xff] %vm3789_vm3, %v3775_v36  ;;  %vm3707_vm8 = vcmp.ge.f32.partialorder %v3675_v35, 0.0  ;;  %v3746_v41 = vmul.f32 %v6400_v56, %v3675_v35  ;;  %v5158_v42 = vadd.f32 %v5121_v40, %v4921_v39  ;;  %v2005_v43 = vpop.f32.mrb[23].mxu1  ;;  %v3566_v44 = vpop.f32.mrb[23].mxu0 }
 0x1f6   : > { %vm3706_vm9 = vcmp.ge.f32.partialorder %v3674_v38, 0.0  ;;  %v3745_v51 = vmul.f32 %v6400_v56, %v3674_v38  ;;  %v5159_v45 = vadd.f32 %v3566_v44, %v2005_v43 }
 0x1f7   : > { %v3778_v53 = vsel %vm3707_vm8, %v3675_v35, %v3746_v41  ;;  %v3677_v54 = vadd.f32 %v5158_v42, %v6394_v52 }
 0x1f8   : > { %3811 = vst.msk [vmem:[%s6407_s22 + $0xa8] sm:$0xff] %vm3789_vm3, %v3778_v53  ;;  %v3777_v46 = vsel %vm3706_vm9, %v3674_v38, %v3745_v51  ;;  %v3676_v58 = vadd.f32 %v5159_v45, %v6394_v52  ;;  %v4924_v59 = vpop.f32.mrb[24].mxu1  ;;  %v5124_v60 = vpop.f32.mrb[24].mxu0 }
 0x1f9   : > { %3810 = vst.msk [vmem:[%s6407_s22 + $0xa0] sm:$0xff] %vm3789_vm3, %v3777_v46  ;;  %vm3709_vm10 = vcmp.ge.f32.partialorder %v3677_v54, 0.0  ;;  %v3748_v62 = vmul.f32 %v6400_v56, %v3677_v54  ;;  %v5160_v63 = vadd.f32 %v5124_v60, %v4924_v59  ;;  %v2015_v0 = vpop.f32.mrb[25].mxu1  ;;  %v3576_v47 = vpop.f32.mrb[25].mxu0 }
 0x1fa   : > { %vm3708_vm11 = vcmp.ge.f32.partialorder %v3676_v58, 0.0  ;;  %v3747_v2 = vmul.f32 %v6400_v56, %v3676_v58  ;;  %v5161_v4 = vadd.f32 %v3576_v47, %v2015_v0 }
 0x1fb   : > { %v3780_v48 = vsel %vm3709_vm10, %v3677_v54, %v3748_v62  ;;  %v3679_v5 = vadd.f32 %v5160_v63, %v6394_v52 }
 0x1fc   : > { %3813 = vst.msk [vmem:[%s6407_s22 + $0xb8] sm:$0xff] %vm3789_vm3, %v3780_v48  ;;  %v3779_v6 = vsel %vm3708_vm11, %v3676_v58, %v3747_v2  ;;  %v3678_v7 = vadd.f32 %v5161_v4, %v6394_v52  ;;  %v4927_v9 = vpop.f32.mrb[26].mxu1  ;;  %v5127_v10 = vpop.f32.mrb[26].mxu0 }
 0x1fd   : > { %3812 = vst.msk [vmem:[%s6407_s22 + $0xb0] sm:$0xff] %vm3789_vm3, %v3779_v6  ;;  %vm3711_vm12 = vcmp.ge.f32.partialorder %v3679_v5, 0.0  ;;  %v3750_v55 = vmul.f32 %v6400_v56, %v3679_v5  ;;  %v5162_v57 = vadd.f32 %v5127_v10, %v4927_v9  ;;  %v2025_v49 = vpop.f32.mrb[27].mxu1  ;;  %v3586_v28 = vpop.f32.mrb[27].mxu0 }
 0x1fe   : > { %vm3710_vm13 = vcmp.ge.f32.partialorder %v3678_v7, 0.0  ;;  %v3749_v24 = vmul.f32 %v6400_v56, %v3678_v7  ;;  %v5163_v50 = vadd.f32 %v3586_v28, %v2025_v49 }
 0x1ff   : > { %v3782_v25 = vsel %vm3711_vm12, %v3679_v5, %v3750_v55  ;;  %v3681_v8 = vadd.f32 %v5162_v57, %v6394_v52 }
 0x200   : > { %3815 = vst.msk [vmem:[%s6407_s22 + $0xc8] sm:$0xff] %vm3789_vm3, %v3782_v25  ;;  %v3781_v11 = vsel %vm3710_vm13, %v3678_v7, %v3749_v24  ;;  %v3680_v13 = vadd.f32 %v5163_v50, %v6394_v52  ;;  %v4930_v15 = vpop.f32.mrb[28].mxu1  ;;  %v5130_v17 = vpop.f32.mrb[28].mxu0 }
 0x201   : > { %3814 = vst.msk [vmem:[%s6407_s22 + $0xc0] sm:$0xff] %vm3789_vm3, %v3781_v11  ;;  %vm3713_vm14 = vcmp.ge.f32.partialorder %v3681_v8, 0.0  ;;  %v3752_v19 = vmul.f32 %v6400_v56, %v3681_v8  ;;  %v5164_v21 = vadd.f32 %v5130_v17, %v4930_v15  ;;  %v2035_v22 = vpop.f32.mrb[29].mxu1  ;;  %v3596_v37 = vpop.f32.mrb[29].mxu0 }
 0x202   : > { %vm3712_vm15 = vcmp.ge.f32.partialorder %v3680_v13, 0.0  ;;  %v3751_v33 = vmul.f32 %v6400_v56, %v3680_v13  ;;  %v5165_v12 = vadd.f32 %v3596_v37, %v2035_v22 }
 0x203   : > { %v3784_v16 = vsel %vm3713_vm14, %v3681_v8, %v3752_v19  ;;  %v3683_v20 = vadd.f32 %v5164_v21, %v6394_v52 }
 0x204   : > { %3817 = vst.msk [vmem:[%s6407_s22 + $0xd8] sm:$0xff] %vm3789_vm3, %v3784_v16  ;;  %v3783_v1 = vsel %vm3712_vm15, %v3680_v13, %v3751_v33  ;;  %v3682_v3 = vadd.f32 %v5165_v12, %v6394_v52  ;;  %v4933_v61 = vpop.f32.mrb[30].mxu1  ;;  %v5133_v14 = vpop.f32.mrb[30].mxu0 }
 0x205   : > { %3816 = vst.msk [vmem:[%s6407_s22 + $0xd0] sm:$0xff] %vm3789_vm3, %v3783_v1  ;;  %vm3715_vm0 = vcmp.ge.f32.partialorder %v3683_v20, 0.0  ;;  %v3754_v18 = vmul.f32 %v6400_v56, %v3683_v20  ;;  %v5166_v23 = vadd.f32 %v5133_v14, %v4933_v61  ;;  %v2045_v26 = vpop.f32.mrb[31].mxu1  ;;  %v3606_v27 = vpop.f32.mrb[31].mxu0 }
 0x206   : > { %vm3714_vm1 = vcmp.ge.f32.partialorder %v3682_v3, 0.0  ;;  %v3753_v29 = vmul.f32 %v6400_v56, %v3682_v3  ;;  %v5167_v30 = vadd.f32 %v3606_v27, %v2045_v26 }
 0x207   : > { %v3786_v31 = vsel %vm3715_vm0, %v3683_v20, %v3754_v18  ;;  %v3685_v32 = vadd.f32 %v5166_v23, %v6394_v52 }
 0x208   : > { %3819 = vst.msk [vmem:[%s6407_s22 + $0xe8] sm:$0xff] %vm3789_vm3, %v3786_v31  ;;  %v3785_v34 = vsel %vm3714_vm1, %v3682_v3, %v3753_v29  ;;  %v3684_v35 = vadd.f32 %v5167_v30, %v6394_v52 }
 0x209   : > { %3818 = vst.msk [vmem:[%s6407_s22 + $0xe0] sm:$0xff] %vm3789_vm3, %v3785_v34  ;;  %vm3717_vm2 = vcmp.ge.f32.partialorder %v3685_v32, 0.0  ;;  %v3756_v36 = vmul.f32 %v6400_v56, %v3685_v32 }
 0x20a   : > { %vm3716_vm4 = vcmp.ge.f32.partialorder %v3684_v35, 0.0  ;;  %v3755_v38 = vmul.f32 %v6400_v56, %v3684_v35 }
 0x20b   : > { %v3788_v39 = vsel %vm3717_vm2, %v3685_v32, %v3756_v36 }
 0x20c   : > { %3821 = vst.msk [vmem:[%s6407_s22 + $0xf8] sm:$0xff] %vm3789_vm3, %v3788_v39  ;;  %v3787_v40 = vsel %vm3716_vm4, %v3684_v35, %v3755_v38 }
 0x20d   : > { %3820 = vst.msk [vmem:[%s6407_s22 + $0xf0] sm:$0xff] %vm3789_vm3, %v3787_v40 }
 0x20e PF: > { %s14_s15 = sadd.s32 1, %s5407_s15  }
 0x20f   : > { %p11_p4 = scmp.ge.s32.totalorder %s14_s15, 4  }
 0x211   :  { %13 = sbr.rel (!%p11_p4) target bundleno = 1 (0x1), region = 76 }

</bundles_post_ra>
